<compile_context>
chip_gen: v5e
topology: v5e:2x2
jax: 0.10.0
libtpu: 0.0.40
codegen_flags: <defaults>
</compile_context>

<pallas_src>
import functools
import math

import jax
import jax.numpy as jnp
from jax.experimental import pallas as pl
from jax.experimental.pallas import tpu as pltpu


# ----------------------------- glue (plain JAX) -----------------------------

def positional_encoding(max_len, d_model):
    """Same table as the torch PositionalEncoding buffer (pe[pos, dim])."""
    position = jnp.arange(max_len, dtype=jnp.float32)[:, None]               # [S,1]
    div_term = jnp.exp(jnp.arange(0, d_model, 2, dtype=jnp.float32)
                       * (-math.log(10000.0) / d_model))                     # [D/2]
    pe = jnp.zeros((max_len, d_model), jnp.float32)
    pe = pe.at[:, 0::2].set(jnp.sin(position * div_term))
    pe = pe.at[:, 1::2].set(jnp.cos(position * div_term))
    return pe


def get_key_pad_bias(seq_k):
    """[B, 1, S] f32 additive bias: -1e9 where the KEY token == 0 (pad).

    Key-only (O(S)) and already in additive form, so the kernel does a single
    broadcast add per head instead of a broadcast + select per layer*head.
    """
    return jnp.where(seq_k == 0, -1e9, 0.0).astype(jnp.float32)[:, None, :]


# ------------------------------ Pallas kernel -------------------------------

def _layer_norm_1pass(x, gamma, beta, eps=1e-5):
    # One-pass stats: var = E[x^2] - E[x]^2 -> half the cross-lane reductions.
    mu = jnp.mean(x, axis=-1, keepdims=True)
    ms = jnp.mean(x * x, axis=-1, keepdims=True)
    var = ms - mu * mu
    return (x - mu) * jax.lax.rsqrt(var + eps) * gamma + beta


def encoder_layer_kernel(x_ref, bias_ref,
                         wqkv_ref, wo_ref, g1_ref, b1_ref,
                         w1_ref, w2_ref, g2_ref, b2_ref,
                         o_ref, ctx_ref,
                         *, n_heads, d_k, d_v, mxu_dtype):
    """One encoder layer per grid step; grid = (batch, layer)."""
    # Output block index is constant along the layer axis -> o_ref is the
    # residual stream, resident in VMEM across layers (written back to HBM
    # only when the batch index changes).
    @pl.when(pl.program_id(1) == 0)
    def _():
        o_ref[0] = x_ref[0]                    # init residual stream with x + PE

    h = o_ref[0].astype(jnp.float32)           # [S, D]  residual stream in f32
    bias = bias_ref[0]                         # [1, S]  additive key-pad bias

    xin = h.astype(mxu_dtype)

    # --- multi-head self-attention: fused QKV projection (one wide matmul) ---
    # 1/sqrt(d_k) is baked into the Q slab of wqkv at param-prep time.
    qkv = jnp.dot(xin, wqkv_ref[0], preferred_element_type=jnp.float32)   # [S, H*(2dk+dv)]
    k_base = n_heads * d_k
    v_base = 2 * n_heads * d_k

    for hd in range(n_heads):                  # static head loop; slices of qkv
        q = qkv[:, hd * d_k:(hd + 1) * d_k]                               # [S, dk]
        k = qkv[:, k_base + hd * d_k:k_base + (hd + 1) * d_k]             # [S, dk]
        v = qkv[:, v_base + hd * d_v:v_base + (hd + 1) * d_v]             # [S, dv]

        # Q @ K^T without materializing K.T: contract the last axes (MXU path).
        scores = jax.lax.dot_general(
            q.astype(mxu_dtype), k.astype(mxu_dtype),
            (((1,), (1,)), ((), ())),
            preferred_element_type=jnp.float32) + bias                    # [S, S]

        scores = scores - jnp.max(scores, axis=-1, keepdims=True)
        p = jnp.exp(scores)
        # approx reciprocal runs on the EUP (free slot); ~1e-3 rel. error in
        # attention weights -- within the test tolerance, not bit-parity.
        attn = p * pl.reciprocal(jnp.sum(p, axis=-1, keepdims=True), approx=True)

        # Per-head context written into a lane-dense VMEM slab (no concat).
        ctx_ref[:, hd * d_v:(hd + 1) * d_v] = jnp.dot(
            attn.astype(mxu_dtype), v.astype(mxu_dtype),
            preferred_element_type=jnp.float32)                            # [S, dv]

    # Fused output projection: one K = H*d_v contraction.
    attn_out = jnp.dot(ctx_ref[...].astype(mxu_dtype), wo_ref[0],
                       preferred_element_type=jnp.float32)                 # [S, D]
    h1 = _layer_norm_1pass(attn_out + h, g1_ref[0], b1_ref[0])

    # --- position-wise FFN: Linear -> ReLU -> Linear (no bias) ---
    hid = jnp.maximum(
        jnp.dot(h1.astype(mxu_dtype), w1_ref[0],
                preferred_element_type=jnp.float32), 0.0)                  # [S, d_ff]
    ffn = jnp.dot(hid.astype(mxu_dtype), w2_ref[0],
                  preferred_element_type=jnp.float32)                      # [S, D]
    o_ref[0] = _layer_norm_1pass(ffn + h1, g2_ref[0], b2_ref[0]).astype(o_ref.dtype)


# ------------------------------ kernel wrapper -------------------------------

def _vmem_limit_bytes(per_layer_weight_bytes, S, D, d_ff, n_heads, d_k, d_v):
    io = 2 * S * D * 4 + S * 4                      # x tile + out tile + bias row
    inter = 4 * (S * n_heads * (2 * d_k + d_v)      # fused QKV result (f32)
                 + 2 * S * S                        # scores + exp(scores)
                 + S * d_ff                         # FFN hidden
                 + 6 * S * D)                       # residual / LN temporaries
    scratch = 4 * S * n_heads * d_v                 # ctx slab
    # inputs (per-layer weights + io blocks) are double-buffered by the pipeline
    need = 2 * (per_layer_weight_bytes + io) + inter + scratch + (8 << 20)
    try:
        cap = int(getattr(pltpu.get_tpu_info(), "vmem_capacity_bytes", 64 << 20))
    except Exception:  # hardware-info query only; fall back to the v7x floor
        cap = 64 << 20
    return int(min(max(need, 32 << 20), cap))


def _encoder_stack(x, key_bias, params, *, n_heads, d_k, d_v, mxu_dtype):
    B, S, D = x.shape
    L = params['wq'].shape[0]
    d_ff = params['w1'].shape[-1]

    def fuse(w):                                     # [L,H,D,e] -> [L, D, H*e]
        Lw, H, Din, e = w.shape
        return jnp.transpose(w, (0, 2, 1, 3)).reshape(Lw, Din, H * e)

    scale = 1.0 / math.sqrt(d_k)
    # Fused QKV weight, scale folded into the Q slab; cast once in the wrapper
    # (halves HBM->VMEM weight DMA in the bf16 path). LN affine params stay f32.
    wqkv = jnp.concatenate([fuse(params['wq']) * scale,
                            fuse(params['wk']),
                            fuse(params['wv'])], axis=-1).astype(mxu_dtype)

    weights = [
        wqkv,                                   # [L, D, H*(2*dk+dv)]
        params['wo'].astype(mxu_dtype),         # [L, H*dv, D]
        params['g1'].astype(jnp.float32),       # [L, 1, D]
        params['b1'].astype(jnp.float32),
        params['w1'].astype(mxu_dtype),         # [L, D, d_ff]
        params['w2'].astype(mxu_dtype),         # [L, d_ff, D]
        params['g2'].astype(jnp.float32),
        params['b2'].astype(jnp.float32),
    ]
    per_layer_wbytes = sum(int(w.size) // L * w.dtype.itemsize for w in weights)

    kernel = functools.partial(encoder_layer_kernel, n_heads=n_heads,
                               d_k=d_k, d_v=d_v, mxu_dtype=mxu_dtype)

    return pl.pallas_call(
        kernel,
        out_shape=jax.ShapeDtypeStruct((B, S, D), x.dtype),
        grid_spec=pltpu.PrefetchScalarGridSpec(
            num_scalar_prefetch=0,
            grid=(B, L),                                        # layer axis LAST
            in_specs=[
                pl.BlockSpec((1, S, D), lambda b, l: (b, 0, 0)),   # x + PE
                pl.BlockSpec((1, 1, S), lambda b, l: (b, 0, 0)),   # key-pad bias
            ] + [pl.BlockSpec((1,) + w.shape[1:], lambda b, l: (l, 0, 0))
                 for w in weights],                                # layer-l weight slab
            out_specs=pl.BlockSpec((1, S, D), lambda b, l: (b, 0, 0)),  # residual-resident
            scratch_shapes=[pltpu.VMEM((S, n_heads * d_v), jnp.float32)],
        ),
        compiler_params=pltpu.CompilerParams(
            dimension_semantics=("parallel", "arbitrary"),      # batch across TCs; layer serial
            vmem_limit_bytes=_vmem_limit_bytes(per_layer_wbytes, S, D, d_ff,
                                               n_heads, d_k, d_v)),
    )(x, key_bias, *weights)


# ------------------------- module-level forward pass -------------------------

def encoder_attention_block(input_seq, input_seq_emb, params,
                            *, n_heads, d_k, d_v, mxu_dtype=jnp.float32):
    B, S, D = input_seq_emb.shape
    pe = positional_encoding(S, D)                         # [S, D]
    # pos_emb(x.transpose(0,1)).transpose(0,1)  ==  x + pe (dropout is eval-mode identity)
    x = (input_seq_emb + pe[None, :, :]).astype(jnp.float32)
    key_bias = get_key_pad_bias(input_seq)                 # [B, 1, S] f32
    return _encoder_stack(x, key_bias, params, n_heads=n_heads, d_k=d_k, d_v=d_v,
                          mxu_dtype=mxu_dtype)


# --------------------------- pure-JAX reference ------------------------------

def _layer_norm_ref(x, gamma, beta, eps=1e-5):
    mu = jnp.mean(x, axis=-1, keepdims=True)
    var = jnp.mean((x - mu) ** 2, axis=-1, keepdims=True)
    return (x - mu) * jax.lax.rsqrt(var + eps) * gamma + beta


def encoder_attention_block_ref(input_seq, input_seq_emb, params, *, n_heads, d_k, d_v):
    B, S, D = input_seq_emb.shape
    x = input_seq_emb + positional_encoding(S, D)[None]
    pad = (input_seq == 0)[:, None, None, :]                          # [B,1,1,S]
    L = params['wq'].shape[0]
    hp = 'highest'
    for l in range(L):
        q = jnp.einsum('bsd,hde->bhse', x, params['wq'][l], precision=hp)
        k = jnp.einsum('bsd,hde->bhse', x, params['wk'][l], precision=hp)
        v = jnp.einsum('bsd,hde->bhse', x, params['wv'][l], precision=hp)
        scores = jnp.einsum('bhqe,bhke->bhqk', q, k, precision=hp) / math.sqrt(d_k)
        scores = jnp.where(pad, -1e9, scores)
        attn = jax.nn.softmax(scores, axis=-1)
        ctx = jnp.einsum('bhqk,bhke->bhqe', attn, v, precision=hp)
        ctx = ctx.transpose(0, 2, 1, 3).reshape(B, S, n_heads * d_v)
        attn_out = jnp.einsum('bsc,cd->bsd', ctx, params['wo'][l], precision=hp)
        h1 = _layer_norm_ref(attn_out + x, params['g1'][l], params['b1'][l])
        hid = jax.nn.relu(jnp.einsum('bsd,df->bsf', h1, params['w1'][l], precision=hp))
        ffn = jnp.einsum('bsf,fd->bsd', hid, params['w2'][l], precision=hp)
        x = _layer_norm_ref(ffn + h1, params['g2'][l], params['b2'][l])
    return x


# ----------------------------- parameter setup ------------------------------

def init_params(key, d_model, d_k, d_v, d_ff, n_heads, n_layers):
    def lin(k, fan_in, fan_out):
        bound = 1.0 / math.sqrt(fan_in)                    # torch Linear default-ish
        return jax.random.uniform(k, (fan_in, fan_out), jnp.float32, -bound, bound)

    def head_major(w, d_head):
        # [d_model, H*d_head] (x @ W layout) -> [H, d_model, d_head]
        d_in = w.shape[0]
        return w.reshape(d_in, n_heads, d_head).transpose(1, 0, 2)

    acc = {k: [] for k in ('wq', 'wk', 'wv', 'wo', 'w1', 'w2', 'g1', 'b1', 'g2', 'b2')}
    for i in range(n_layers):
        ks = jax.random.split(jax.random.fold_in(key, i), 6)
        acc['wq'].append(head_major(lin(ks[0], d_model, d_k * n_heads), d_k))
        acc['wk'].append(head_major(lin(ks[1], d_model, d_k * n_heads), d_k))
        acc['wv'].append(head_major(lin(ks[2], d_model, d_v * n_heads), d_v))
        acc['wo'].append(lin(ks[3], d_v * n_heads, d_model))
        acc['w1'].append(lin(ks[4], d_model, d_ff))
        acc['w2'].append(lin(ks[5], d_ff, d_model))
        acc['g1'].append(jnp.ones((1, d_model), jnp.float32))
        acc['b1'].append(jnp.zeros((1, d_model), jnp.float32))
        acc['g2'].append(jnp.ones((1, d_model), jnp.float32))
        acc['b2'].append(jnp.zeros((1, d_model), jnp.float32))
    return {k: jnp.stack(v, axis=0) for k, v in acc.items()}   # stacked over layers


# ----------------------------------- main ------------------------------------

if __name__ == "__main__":
    # d_model chosen = 128 so activations/outputs are lane-dense (no masked stores).
    B, S = 2, 8
    d_model, d_k, d_v, d_ff, n_heads, n_layers = 128, 64, 64, 256, 2, 2

    key = jax.random.PRNGKey(0)
    k1, k2, k3 = jax.random.split(key, 3)

    # token ids with trailing padding (0) to exercise the attention pad mask
    input_seq = jax.random.randint(k1, (B, S), 1, 100, dtype=jnp.int32)
    lengths = jnp.array([8, 5])
    input_seq = jnp.where(jnp.arange(S)[None, :] < lengths[:, None], input_seq, 0)

    input_seq_emb = jax.random.normal(k2, (B, S, d_model), jnp.float32)
    params = init_params(k3, d_model, d_k, d_v, d_ff, n_heads, n_layers)

    # f32 path (module semantics)
    out = encoder_attention_block(input_seq, input_seq_emb, params,
                                  n_heads=n_heads, d_k=d_k, d_v=d_v)
    out = jax.block_until_ready(out)
    assert out.shape == (B, S, d_model) and out.dtype == jnp.float32
    assert bool(jnp.all(jnp.isfinite(out)))

    ref = encoder_attention_block_ref(input_seq, input_seq_emb, params,
                                      n_heads=n_heads, d_k=d_k, d_v=d_v)
    max_err = float(jnp.max(jnp.abs(out - ref)))
    assert max_err < 1e-2, f"kernel vs reference mismatch: {max_err}"

    # bf16-on-MXU path (recommended on v6e/v7x): bf16 matmuls, f32 softmax/LN/residual
    out_bf16 = encoder_attention_block(input_seq, input_seq_emb, params,
                                       n_heads=n_heads, d_k=d_k, d_v=d_v,
                                       mxu_dtype=jnp.bfloat16)
    out_bf16 = jax.block_until_ready(out_bf16)
    assert bool(jnp.all(jnp.isfinite(out_bf16)))
    assert float(jnp.max(jnp.abs(out_bf16.astype(jnp.float32) - out))) < 0.5

    print("KERNEL_OK")
</pallas_src>

<mosaic_0001>
module attributes {stable_mosaic.version = 11 : i64} {
  func.func @encoder_layer_kernel(%arg0: i32, %arg1: i32, %arg2: memref<1x8x128xf32, #tpu.memory_space<vmem>>, %arg3: memref<1x1x8xf32, #tpu.memory_space<vmem>>, %arg4: memref<1x128x384xf32, #tpu.memory_space<vmem>>, %arg5: memref<1x128x128xf32, #tpu.memory_space<vmem>>, %arg6: memref<1x1x128xf32, #tpu.memory_space<vmem>>, %arg7: memref<1x1x128xf32, #tpu.memory_space<vmem>>, %arg8: memref<1x128x256xf32, #tpu.memory_space<vmem>>, %arg9: memref<1x256x128xf32, #tpu.memory_space<vmem>>, %arg10: memref<1x1x128xf32, #tpu.memory_space<vmem>>, %arg11: memref<1x1x128xf32, #tpu.memory_space<vmem>>, %arg12: memref<1x8x128xf32, #tpu.memory_space<vmem>>, %arg13: memref<8x128xf32, #tpu.memory_space<vmem>>) attributes {dimension_semantics = [#tpu.dimension_semantics<parallel>, #tpu.dimension_semantics<arbitrary>], iteration_bounds = array<i64: 2, 2>, scalar_prefetch = 0 : i64, scratch_operands = 1 : i64, tpu.core_type = #tpu.core_type<tc>, window_params = [{transform_indices = @transform_0, window_bounds = array<i64: 1, 8, 128>}, {transform_indices = @transform_1, window_bounds = array<i64: 1, 1, 8>}, {transform_indices = @transform_2, window_bounds = array<i64: 1, 128, 384>}, {transform_indices = @transform_3, window_bounds = array<i64: 1, 128, 128>}, {transform_indices = @transform_4, window_bounds = array<i64: 1, 1, 128>}, {transform_indices = @transform_5, window_bounds = array<i64: 1, 1, 128>}, {transform_indices = @transform_6, window_bounds = array<i64: 1, 128, 256>}, {transform_indices = @transform_7, window_bounds = array<i64: 1, 256, 128>}, {transform_indices = @transform_8, window_bounds = array<i64: 1, 1, 128>}, {transform_indices = @transform_9, window_bounds = array<i64: 1, 1, 128>}, {transform_indices = @transform_10, window_bounds = array<i64: 1, 8, 128>}]} {
    %c0_i32 = arith.constant 0 : i32
    %0 = arith.cmpi eq, %arg1, %c0_i32 : i32
    %1 = arith.extui %0 : i1 to i32
    %c0_i32_0 = arith.constant 0 : i32
    %2 = arith.cmpi ne, %1, %c0_i32_0 : i32
    scf.if %2 {
      %c0_60 = arith.constant 0 : index
      %c0_61 = arith.constant 0 : index
      %c0_62 = arith.constant 0 : index
      %115 = vector.load %arg2[%c0_60, %c0_61, %c0_62] : memref<1x8x128xf32, #tpu.memory_space<vmem>>, vector<1x8x128xf32>
      %116 = vector.shape_cast %115 : vector<1x8x128xf32> to vector<8x128xf32>
      %c0_63 = arith.constant 0 : index
      %c0_64 = arith.constant 0 : index
      %c0_65 = arith.constant 0 : index
      %117 = vector.load %arg12[%c0_63, %c0_64, %c0_65] : memref<1x8x128xf32, #tpu.memory_space<vmem>>, vector<1x8x128xf32>
      %118 = vector.shape_cast %117 : vector<1x8x128xf32> to vector<8x128xf32>
      %119 = vector.shape_cast %116 : vector<8x128xf32> to vector<1x8x128xf32>
      tpu.vector_store %arg12[%c0_63, %c0_64, %c0_65], %119 {strides = array<i32>} : memref<1x8x128xf32, #tpu.memory_space<vmem>>, vector<1x8x128xf32>,
    } else {
    }
    %c0 = arith.constant 0 : index
    %c0_1 = arith.constant 0 : index
    %c0_2 = arith.constant 0 : index
    %3 = vector.load %arg12[%c0, %c0_1, %c0_2] : memref<1x8x128xf32, #tpu.memory_space<vmem>>, vector<1x8x128xf32>
    %4 = vector.shape_cast %3 : vector<1x8x128xf32> to vector<8x128xf32>
    %c0_3 = arith.constant 0 : index
    %c0_4 = arith.constant 0 : index
    %c0_5 = arith.constant 0 : index
    %5 = vector.load %arg3[%c0_3, %c0_4, %c0_5] : memref<1x1x8xf32, #tpu.memory_space<vmem>>, vector<1x1x8xf32>
    %6 = vector.shape_cast %5 : vector<1x1x8xf32> to vector<1x8xf32>
    %c0_6 = arith.constant 0 : index
    %c0_7 = arith.constant 0 : index
    %c0_8 = arith.constant 0 : index
    %7 = vector.load %arg4[%c0_6, %c0_7, %c0_8] : memref<1x128x384xf32, #tpu.memory_space<vmem>>, vector<1x128x384xf32>
    %8 = vector.shape_cast %7 : vector<1x128x384xf32> to vector<128x384xf32>
    %cst = arith.constant dense<0.000000e+00> : vector<8x384xf32>
    %9 = tpu.matmul %4, %8, %cst {dimension_numbers = #tpu.dot_dimension_numbers<[1], [0], [0], [1], [0, 0, 1, 1], [], []>} : vector<8x128xf32>, vector<128x384xf32>, vector<8x384xf32> -> vector<8x384xf32>
    %10 = vector.extract_strided_slice %9 {offsets = [0, 0], sizes = [8, 64], strides = [1, 1]} : vector<8x384xf32> to vector<8x64xf32>
    %11 = vector.extract_strided_slice %9 {offsets = [0, 128], sizes = [8, 64], strides = [1, 1]} : vector<8x384xf32> to vector<8x64xf32>
    %12 = vector.extract_strided_slice %9 {offsets = [0, 256], sizes = [8, 64], strides = [1, 1]} : vector<8x384xf32> to vector<8x64xf32>
    %cst_9 = arith.constant dense<0.000000e+00> : vector<8x8xf32>
    %13 = tpu.matmul %10, %11, %cst_9 {dimension_numbers = #tpu.dot_dimension_numbers<[1], [1], [0], [0], [0, 0, 1, 0], [], []>} : vector<8x64xf32>, vector<8x64xf32>, vector<8x8xf32> -> vector<8x8xf32>
    %14 = vector.broadcast %6 : vector<1x8xf32> to vector<8x8xf32>
    %15 = arith.addf %13, %14 : vector<8x8xf32>
    %cst_10 = arith.constant dense<0xFF800000> : vector<8xf32>
    %16 = vector.multi_reduction <maximumf>, %15, %cst_10 [1] : vector<8x8xf32> to vector<8xf32>
    %17 = vector.shape_cast %16 : vector<8xf32> to vector<8x1xf32>
    %18 = vector.broadcast %17 : vector<8x1xf32> to vector<8x8xf32>
    %19 = arith.subf %15, %18 : vector<8x8xf32>
    %20 = math.exp %19 : vector<8x8xf32>
    %cst_11 = arith.constant dense<0.000000e+00> : vector<8xf32>
    %21 = vector.multi_reduction <add>, %20, %cst_11 [1] : vector<8x8xf32> to vector<8xf32>
    %22 = vector.shape_cast %21 : vector<8xf32> to vector<8x1xf32>
    %23 = tpu.reciprocal %22 {approx = true} : vector<8x1xf32> -> vector<8x1xf32>
    %24 = vector.broadcast %23 : vector<8x1xf32> to vector<8x8xf32>
    %25 = arith.mulf %20, %24 : vector<8x8xf32>
    %cst_12 = arith.constant dense<0.000000e+00> : vector<8x64xf32>
    %26 = tpu.matmul %25, %12, %cst_12 {dimension_numbers = #tpu.dot_dimension_numbers<[1], [0], [0], [1], [0, 0, 1, 1], [], []>} : vector<8x8xf32>, vector<8x64xf32>, vector<8x64xf32> -> vector<8x64xf32>
    %c0_13 = arith.constant 0 : index
    %c0_14 = arith.constant 0 : index
    %27 = vector.load %arg13[%c0_13, %c0_14] : memref<8x128xf32, #tpu.memory_space<vmem>>, vector<8x64xf32>
    tpu.vector_store %arg13[%c0_13, %c0_14], %26 {strides = array<i32>} : memref<8x128xf32, #tpu.memory_space<vmem>>, vector<8x64xf32>,
    %28 = vector.extract_strided_slice %9 {offsets = [0, 64], sizes = [8, 64], strides = [1, 1]} : vector<8x384xf32> to vector<8x64xf32>
    %29 = vector.extract_strided_slice %9 {offsets = [0, 192], sizes = [8, 64], strides = [1, 1]} : vector<8x384xf32> to vector<8x64xf32>
    %30 = vector.extract_strided_slice %9 {offsets = [0, 320], sizes = [8, 64], strides = [1, 1]} : vector<8x384xf32> to vector<8x64xf32>
    %cst_15 = arith.constant dense<0.000000e+00> : vector<8x8xf32>
    %31 = tpu.matmul %28, %29, %cst_15 {dimension_numbers = #tpu.dot_dimension_numbers<[1], [1], [0], [0], [0, 0, 1, 0], [], []>} : vector<8x64xf32>, vector<8x64xf32>, vector<8x8xf32> -> vector<8x8xf32>
    %32 = vector.broadcast %6 : vector<1x8xf32> to vector<8x8xf32>
    %33 = arith.addf %31, %32 : vector<8x8xf32>
    %cst_16 = arith.constant dense<0xFF800000> : vector<8xf32>
    %34 = vector.multi_reduction <maximumf>, %33, %cst_16 [1] : vector<8x8xf32> to vector<8xf32>
    %35 = vector.shape_cast %34 : vector<8xf32> to vector<8x1xf32>
    %36 = vector.broadcast %35 : vector<8x1xf32> to vector<8x8xf32>
    %37 = arith.subf %33, %36 : vector<8x8xf32>
    %38 = math.exp %37 : vector<8x8xf32>
    %cst_17 = arith.constant dense<0.000000e+00> : vector<8xf32>
    %39 = vector.multi_reduction <add>, %38, %cst_17 [1] : vector<8x8xf32> to vector<8xf32>
    %40 = vector.shape_cast %39 : vector<8xf32> to vector<8x1xf32>
    %41 = tpu.reciprocal %40 {approx = true} : vector<8x1xf32> -> vector<8x1xf32>
    %42 = vector.broadcast %41 : vector<8x1xf32> to vector<8x8xf32>
    %43 = arith.mulf %38, %42 : vector<8x8xf32>
    %cst_18 = arith.constant dense<0.000000e+00> : vector<8x64xf32>
    %44 = tpu.matmul %43, %30, %cst_18 {dimension_numbers = #tpu.dot_dimension_numbers<[1], [0], [0], [1], [0, 0, 1, 1], [], []>} : vector<8x8xf32>, vector<8x64xf32>, vector<8x64xf32> -> vector<8x64xf32>
    %c0_19 = arith.constant 0 : index
    %c64 = arith.constant 64 : index
    %45 = vector.load %arg13[%c0_19, %c64] : memref<8x128xf32, #tpu.memory_space<vmem>>, vector<8x64xf32>
    tpu.vector_store %arg13[%c0_19, %c64], %44 {strides = array<i32>} : memref<8x128xf32, #tpu.memory_space<vmem>>, vector<8x64xf32>,
    %c0_20 = arith.constant 0 : index
    %c0_21 = arith.constant 0 : index
    %46 = vector.load %arg13[%c0_20, %c0_21] : memref<8x128xf32, #tpu.memory_space<vmem>>, vector<8x128xf32>
    %c0_22 = arith.constant 0 : index
    %c0_23 = arith.constant 0 : index
    %c0_24 = arith.constant 0 : index
    %47 = vector.load %arg5[%c0_22, %c0_23, %c0_24] : memref<1x128x128xf32, #tpu.memory_space<vmem>>, vector<1x128x128xf32>
    %48 = vector.shape_cast %47 : vector<1x128x128xf32> to vector<128x128xf32>
    %cst_25 = arith.constant dense<0.000000e+00> : vector<8x128xf32>
    %49 = tpu.matmul %46, %48, %cst_25 {dimension_numbers = #tpu.dot_dimension_numbers<[1], [0], [0], [1], [0, 0, 1, 1], [], []>} : vector<8x128xf32>, vector<128x128xf32>, vector<8x128xf32> -> vector<8x128xf32>
    %50 = arith.addf %49, %4 : vector<8x128xf32>
    %c0_26 = arith.constant 0 : index
    %c0_27 = arith.constant 0 : index
    %c0_28 = arith.constant 0 : index
    %51 = vector.load %arg6[%c0_26, %c0_27, %c0_28] : memref<1x1x128xf32, #tpu.memory_space<vmem>>, vector<1x1x128xf32>
    %52 = vector.shape_cast %51 : vector<1x1x128xf32> to vector<1x128xf32>
    %c0_29 = arith.constant 0 : index
    %c0_30 = arith.constant 0 : index
    %c0_31 = arith.constant 0 : index
    %53 = vector.load %arg7[%c0_29, %c0_30, %c0_31] : memref<1x1x128xf32, #tpu.memory_space<vmem>>, vector<1x1x128xf32>
    %54 = vector.shape_cast %53 : vector<1x1x128xf32> to vector<1x128xf32>
    %cst_32 = arith.constant dense<0.000000e+00> : vector<8xf32>
    %55 = vector.multi_reduction <add>, %50, %cst_32 [1] : vector<8x128xf32> to vector<8xf32>
    %56 = vector.shape_cast %55 : vector<8xf32> to vector<8x1xf32>
    %cst_33 = arith.constant 1.280000e+02 : f32
    %57 = vector.broadcast %cst_33 : f32 to vector<8x1xf32>
    %58 = arith.divf %56, %57 : vector<8x1xf32>
    %59 = arith.mulf %50, %50 : vector<8x128xf32>
    %cst_34 = arith.constant dense<0.000000e+00> : vector<8xf32>
    %60 = vector.multi_reduction <add>, %59, %cst_34 [1] : vector<8x128xf32> to vector<8xf32>
    %61 = vector.shape_cast %60 : vector<8xf32> to vector<8x1xf32>
    %cst_35 = arith.constant 1.280000e+02 : f32
    %62 = vector.broadcast %cst_35 : f32 to vector<8x1xf32>
    %63 = arith.divf %61, %62 : vector<8x1xf32>
    %64 = arith.mulf %58, %58 : vector<8x1xf32>
    %65 = arith.subf %63, %64 : vector<8x1xf32>
    %66 = vector.broadcast %58 : vector<8x1xf32> to vector<8x128xf32>
    %67 = arith.subf %50, %66 : vector<8x128xf32>
    %cst_36 = arith.constant 9.99999974E-6 : f32
    %68 = vector.broadcast %cst_36 : f32 to vector<8x1xf32>
    %69 = arith.addf %65, %68 : vector<8x1xf32>
    %70 = math.rsqrt %69 : vector<8x1xf32>
    %71 = vector.broadcast %70 : vector<8x1xf32> to vector<8x128xf32>
    %72 = arith.mulf %67, %71 : vector<8x128xf32>
    %73 = vector.broadcast %52 : vector<1x128xf32> to vector<8x128xf32>
    %74 = arith.mulf %72, %73 : vector<8x128xf32>
    %75 = vector.broadcast %54 : vector<1x128xf32> to vector<8x128xf32>
    %76 = arith.addf %74, %75 : vector<8x128xf32>
    %c0_37 = arith.constant 0 : index
    %c0_38 = arith.constant 0 : index
    %c0_39 = arith.constant 0 : index
    %77 = vector.load %arg8[%c0_37, %c0_38, %c0_39] : memref<1x128x256xf32, #tpu.memory_space<vmem>>, vector<1x128x256xf32>
    %78 = vector.shape_cast %77 : vector<1x128x256xf32> to vector<128x256xf32>
    %cst_40 = arith.constant dense<0.000000e+00> : vector<8x256xf32>
    %79 = tpu.matmul %76, %78, %cst_40 {dimension_numbers = #tpu.dot_dimension_numbers<[1], [0], [0], [1], [0, 0, 1, 1], [], []>} : vector<8x128xf32>, vector<128x256xf32>, vector<8x256xf32> -> vector<8x256xf32>
    %cst_41 = arith.constant 0.000000e+00 : f32
    %80 = vector.broadcast %cst_41 : f32 to vector<8x256xf32>
    %81 = arith.maximumf %79, %80 : vector<8x256xf32>
    %c0_42 = arith.constant 0 : index
    %c0_43 = arith.constant 0 : index
    %c0_44 = arith.constant 0 : index
    %82 = vector.load %arg9[%c0_42, %c0_43, %c0_44] : memref<1x256x128xf32, #tpu.memory_space<vmem>>, vector<1x256x128xf32>
    %83 = vector.shape_cast %82 : vector<1x256x128xf32> to vector<256x128xf32>
    %cst_45 = arith.constant dense<0.000000e+00> : vector<8x128xf32>
    %84 = tpu.matmul %81, %83, %cst_45 {dimension_numbers = #tpu.dot_dimension_numbers<[1], [0], [0], [1], [0, 0, 1, 1], [], []>} : vector<8x256xf32>, vector<256x128xf32>, vector<8x128xf32> -> vector<8x128xf32>
    %85 = arith.addf %84, %76 : vector<8x128xf32>
    %c0_46 = arith.constant 0 : index
    %c0_47 = arith.constant 0 : index
    %c0_48 = arith.constant 0 : index
    %86 = vector.load %arg10[%c0_46, %c0_47, %c0_48] : memref<1x1x128xf32, #tpu.memory_space<vmem>>, vector<1x1x128xf32>
    %87 = vector.shape_cast %86 : vector<1x1x128xf32> to vector<1x128xf32>
    %c0_49 = arith.constant 0 : index
    %c0_50 = arith.constant 0 : index
    %c0_51 = arith.constant 0 : index
    %88 = vector.load %arg11[%c0_49, %c0_50, %c0_51] : memref<1x1x128xf32, #tpu.memory_space<vmem>>, vector<1x1x128xf32>
    %89 = vector.shape_cast %88 : vector<1x1x128xf32> to vector<1x128xf32>
    %cst_52 = arith.constant dense<0.000000e+00> : vector<8xf32>
    %90 = vector.multi_reduction <add>, %85, %cst_52 [1] : vector<8x128xf32> to vector<8xf32>
    %91 = vector.shape_cast %90 : vector<8xf32> to vector<8x1xf32>
    %cst_53 = arith.constant 1.280000e+02 : f32
    %92 = vector.broadcast %cst_53 : f32 to vector<8x1xf32>
    %93 = arith.divf %91, %92 : vector<8x1xf32>
    %94 = arith.mulf %85, %85 : vector<8x128xf32>
    %cst_54 = arith.constant dense<0.000000e+00> : vector<8xf32>
    %95 = vector.multi_reduction <add>, %94, %cst_54 [1] : vector<8x128xf32> to vector<8xf32>
    %96 = vector.shape_cast %95 : vector<8xf32> to vector<8x1xf32>
    %cst_55 = arith.constant 1.280000e+02 : f32
    %97 = vector.broadcast %cst_55 : f32 to vector<8x1xf32>
    %98 = arith.divf %96, %97 : vector<8x1xf32>
    %99 = arith.mulf %93, %93 : vector<8x1xf32>
    %100 = arith.subf %98, %99 : vector<8x1xf32>
    %101 = vector.broadcast %93 : vector<8x1xf32> to vector<8x128xf32>
    %102 = arith.subf %85, %101 : vector<8x128xf32>
    %cst_56 = arith.constant 9.99999974E-6 : f32
    %103 = vector.broadcast %cst_56 : f32 to vector<8x1xf32>
    %104 = arith.addf %100, %103 : vector<8x1xf32>
    %105 = math.rsqrt %104 : vector<8x1xf32>
    %106 = vector.broadcast %105 : vector<8x1xf32> to vector<8x128xf32>
    %107 = arith.mulf %102, %106 : vector<8x128xf32>
    %108 = vector.broadcast %87 : vector<1x128xf32> to vector<8x128xf32>
    %109 = arith.mulf %107, %108 : vector<8x128xf32>
    %110 = vector.broadcast %89 : vector<1x128xf32> to vector<8x128xf32>
    %111 = arith.addf %109, %110 : vector<8x128xf32>
    %c0_57 = arith.constant 0 : index
    %c0_58 = arith.constant 0 : index
    %c0_59 = arith.constant 0 : index
    %112 = vector.load %arg12[%c0_57, %c0_58, %c0_59] : memref<1x8x128xf32, #tpu.memory_space<vmem>>, vector<1x8x128xf32>
    %113 = vector.shape_cast %112 : vector<1x8x128xf32> to vector<8x128xf32>
    %114 = vector.shape_cast %111 : vector<8x128xf32> to vector<1x8x128xf32>
    tpu.vector_store %arg12[%c0_57, %c0_58, %c0_59], %114 {strides = array<i32>} : memref<1x8x128xf32, #tpu.memory_space<vmem>>, vector<1x8x128xf32>,
    return
  }
  func.func @transform_0(%arg0: i32, %arg1: i32) -> (i32, i32, i32) {
    %c0_i32 = arith.constant 0 : i32
    %c0_i32_0 = arith.constant 0 : i32
    %c0_i32_1 = arith.constant 0 : i32
    return %arg0, %c0_i32, %c0_i32_0 : i32, i32, i32
  }
  func.func @transform_1(%arg0: i32, %arg1: i32) -> (i32, i32, i32) {
    %c0_i32 = arith.constant 0 : i32
    %c0_i32_0 = arith.constant 0 : i32
    %c0_i32_1 = arith.constant 0 : i32
    return %arg0, %c0_i32, %c0_i32_0 : i32, i32, i32
  }
  func.func @transform_2(%arg0: i32, %arg1: i32) -> (i32, i32, i32) {
    %c0_i32 = arith.constant 0 : i32
    %c0_i32_0 = arith.constant 0 : i32
    %c0_i32_1 = arith.constant 0 : i32
    return %arg1, %c0_i32, %c0_i32_0 : i32, i32, i32
  }
  func.func @transform_3(%arg0: i32, %arg1: i32) -> (i32, i32, i32) {
    %c0_i32 = arith.constant 0 : i32
    %c0_i32_0 = arith.constant 0 : i32
    %c0_i32_1 = arith.constant 0 : i32
    return %arg1, %c0_i32, %c0_i32_0 : i32, i32, i32
  }
  func.func @transform_4(%arg0: i32, %arg1: i32) -> (i32, i32, i32) {
    %c0_i32 = arith.constant 0 : i32
    %c0_i32_0 = arith.constant 0 : i32
    %c0_i32_1 = arith.constant 0 : i32
    return %arg1, %c0_i32, %c0_i32_0 : i32, i32, i32
  }
  func.func @transform_5(%arg0: i32, %arg1: i32) -> (i32, i32, i32) {
    %c0_i32 = arith.constant 0 : i32
    %c0_i32_0 = arith.constant 0 : i32
    %c0_i32_1 = arith.constant 0 : i32
    return %arg1, %c0_i32, %c0_i32_0 : i32, i32, i32
  }
  func.func @transform_6(%arg0: i32, %arg1: i32) -> (i32, i32, i32) {
    %c0_i32 = arith.constant 0 : i32
    %c0_i32_0 = arith.constant 0 : i32
    %c0_i32_1 = arith.constant 0 : i32
    return %arg1, %c0_i32, %c0_i32_0 : i32, i32, i32
  }
  func.func @transform_7(%arg0: i32, %arg1: i32) -> (i32, i32, i32) {
    %c0_i32 = arith.constant 0 : i32
    %c0_i32_0 = arith.constant 0 : i32
    %c0_i32_1 = arith.constant 0 : i32
    return %arg1, %c0_i32, %c0_i32_0 : i32, i32, i32
  }
  func.func @transform_8(%arg0: i32, %arg1: i32) -> (i32, i32, i32) {
    %c0_i32 = arith.constant 0 : i32
    %c0_i32_0 = arith.constant 0 : i32
    %c0_i32_1 = arith.constant 0 : i32
    return %arg1, %c0_i32, %c0_i32_0 : i32, i32, i32
  }
  func.func @transform_9(%arg0: i32, %arg1: i32) -> (i32, i32, i32) {
    %c0_i32 = arith.constant 0 : i32
    %c0_i32_0 = arith.constant 0 : i32
    %c0_i32_1 = arith.constant 0 : i32
    return %arg1, %c0_i32, %c0_i32_0 : i32, i32, i32
  }
  func.func @transform_10(%arg0: i32, %arg1: i32) -> (i32, i32, i32) {
    %c0_i32 = arith.constant 0 : i32
    %c0_i32_0 = arith.constant 0 : i32
    %c0_i32_1 = arith.constant 0 : i32
    return %arg0, %c0_i32, %c0_i32_0 : i32, i32, i32
  }
}

</mosaic_0001>

<bundles_post_ra>
// kernel: tpu_custom_call.1
= control target key start
LH: loop header
LB: loop body
LE: loop exit
PB: predicated region body
PF: predicated region fallthrough
CT: control target
= control target key end

     0   :  { %s2492_s0 = inlined_call_operand.hbm [shape: f32[2,8,128], index: 0, kind: input, shape index: {}]   ;;  %s2493_s1 = inlined_call_operand.hbm [shape: f32[2,1,8], index: 1, kind: input, shape index: {}]   ;;  %s2494_s2 = inlined_call_operand.hbm [shape: f32[2,128,384], index: 2, kind: input, shape index: {}]   ;;  %s2495_s3 = inlined_call_operand.hbm [shape: f32[2,128,128], index: 3, kind: input, shape index: {}]   ;;  %s2496_s4 = inlined_call_operand.vmem [shape: f32[2,1,128], index: 4, kind: input, shape index: {}]   ;;  %s2497_s5 = inlined_call_operand.vmem [shape: f32[2,1,128], index: 5, kind: input, shape index: {}]   ;;  %s2498_s6 = inlined_call_operand.hbm [shape: f32[2,128,256], index: 6, kind: input, shape index: {}]   ;;  %s2499_s7 = inlined_call_operand.hbm [shape: f32[2,256,128], index: 7, kind: input, shape index: {}]   ;;  %s2500_s8 = inlined_call_operand.vmem [shape: f32[2,1,128], index: 8, kind: input, shape index: {}]   ;;  %s2501_s9 = inlined_call_operand.vmem [shape: f32[2,1,128], index: 9, kind: input, shape index: {}]   ;;  %s2502_s10 = inlined_call_operand.hbm [shape: f32[2,8,128], index: 10, kind: output, shape index: {}]  }
   0x1   :  { %2522 = sst [smem:[#allocation35_spill]] %s2492_s0 }
   0x2   :  { %2523 = sst [smem:[#allocation36_spill]] %s2493_s1 }
   0x3   :  { %2524 = sst [smem:[#allocation37_spill]] %s2494_s2 }
   0x4   :  { %2525 = sst [smem:[#allocation38_spill]] %s2495_s3 }
   0x5   :  { %2526 = sst [smem:[#allocation39_spill]] %s2496_s4 }
   0x6   :  { %2527 = sst [smem:[#allocation40_spill]] %s2497_s5 }
   0x7   :  { %2528 = sst [smem:[#allocation41_spill]] %s2500_s8 }
   0x8   :  { %2529 = sst [smem:[#allocation42_spill]] %s2501_s9 }
   0x9   :  { %2530 = sst [smem:[#allocation43_spill]] %s2502_s10 }
   0xa   :  { %15 = vsyncpa [#allocation4], 0 }
   0xb   :  { %17 = vsyncpa [#allocation4 + $0x1], 0 }
   0xc   :  { %18 = vsyncpa [#allocation7], 0 }
   0xd   :  { %20 = vsyncpa [#allocation7 + $0x1], 0 }
   0xe   :  { %21 = vsyncpa [#allocation10], 0 }
   0xf   :  { %23 = vsyncpa [#allocation10 + $0x1], 0 }
  0x10   :  { %24 = vsyncpa [#allocation13], 0 }
  0x11   :  { %26 = vsyncpa [#allocation13 + $0x1], 0 }
  0x12   :  { %27 = vsyncpa [#allocation5], 0 }
  0x13   :  { %29 = vsyncpa [#allocation5 + $0x1], 0  ;;  %s1965_s13 = smov 0   ;;  %s1967_s14 = smov 0  }
  0x14   :  { %s1969_s15 = smov 0   ;;  %s1971_s16 = smov 0  }
  0x15   :  { %s1973_s17 = smov 0   ;;  %s1975_s18 = smov 0  }
  0x16   :  { %s1977_s19 = smov 0   ;;  %s1979_s20 = smov 0  }
  0x17   :  { %s1981_s21 = smov 0   ;;  %s1983_s22 = smov 0  }
  0x18   :  { %s1985_s23 = smov 0  }
  0x19 LB: > { %2531 = sst [smem:[#allocation21_spill]] %s1868_s15  ;;  %s2021_s24 = sadd.s32 4294967295, %s1900_s23   ;;  %s1900_s23 = sphi %s1985_s23, %s35_s23   ;;  %s1896_s22 = sphi %s1983_s22, %s2586_s22   ;;  %s1892_s21 = sphi %s1981_s21, %s2592_s21   ;;  %s1888_s20 = sphi %s1979_s20, %s2584_s20   ;;  %s1884_s19 = sphi %s1977_s19, %s2591_s19   ;;  %s1880_s18 = sphi %s1975_s18, %s2583_s18   ;;  %s1876_s17 = sphi %s1973_s17, %s2590_s17   ;;  %s1872_s16 = sphi %s1971_s16, %s2589_s16   ;;  %s1868_s15 = sphi %s1969_s15, %s2581_s15   ;;  %s1864_s14 = sphi %s1967_s14, %s2588_s14   ;;  %s1860_s13 = sphi %s1965_s13, %s2587_s13  }
  0x1a   : > { %2532 = sst [smem:[#allocation22_spill]] %s1872_s16  ;;  %s1390_s25 = sadd.s32 4294967294, %s1900_s23  }
  0x1b   : > { %2533 = sst [smem:[#allocation23_spill]] %s1880_s18  ;;  %s44_s26 = sadd.s32 1, %s1892_s21 }
  0x1c   : > { %2534 = sst [smem:[#allocation24_spill]] %s1884_s19  ;;  %s47_s27 = sadd.s32 1, %s1896_s22 }
  0x1d   : > { %2535 = sst [smem:[#allocation25_spill]] %s1888_s20  ;;  %p45_p0 = scmp.ge.s32.totalorder %s44_s26, 2 }
  0x1e   : > { %2536 = sst [smem:[#allocation26_spill]] %s1896_s22  ;;  %s54_s28 = sadd.s32 1, %s1880_s18 }
  0x1f   : > { %2537 = sst [smem:[#allocation27_spill]] %s1900_s23  ;;  %p61_p1 = scmp.ne.s32.totalorder %s1880_s18, %s1876_s17 }
  0x20   : > { %p62_p2 = scmp.eq.s32.totalorder %s1900_s23, 0  ;;  %s2594_s26 = smov (%p45_p0, %s44_s26), 0 }
  0x21   : > { %2538 = sst [smem:[#allocation28_spill]] %s2594_s26  ;;  %s2596_s27 = smov (!%p45_p0, %s47_s27), %s1896_s22 }
  0x22   : > { %p2038_p3 = por %p62_p2, %p61_p1  ;;  %p2505_p4 = scmp.ne.s32.totalorder %s1876_s17, %s1872_s16 }
  0x23   : > { %p49_p5 = scmp.ge.s32.totalorder %s2596_s27, 2  ;;  %p68_p6 = scmp.eq.s32.totalorder %s2021_s24, 0 }
  0x24   : > { %s103_s30 = ssub.s32 %s1892_s21, %s2594_s26  ;;  %s106_s11 = sadd.s32 1, %s1868_s15 }
  0x25   : > { %s2598_s27 = smov (%p49_p5, %s2596_s27), 0  ;;  %p2055_p7 = por %p68_p6, %p2505_p4 }
  0x26   : > { %2540 = sst [smem:[#allocation29_spill]] %s2598_s27  ;;  %p104_p8 = scmp.eq.s32.totalorder %s103_s30, 0 }
  0x27   : > { %s51_s10 = ssub.s32 %s1896_s22, %s2598_s27  ;;  %p113_p9 = scmp.ne.s32.totalorder %s1868_s15, %s1864_s14 }
  0x28   : > { %p52_p10 = scmp.eq.s32.totalorder %s51_s10, 0  ;;  %p119_p11 = scmp.ne.s32.totalorder %s1864_s14, %s1860_s13 }
  0x29   : > { %s2066_s26 = scalar_select %p104_p8, %s1868_s15, %s106_s11  }
  0x2a   : > { %s2069_s20 = scalar_select %p52_p10, %s1880_s18, %s54_s28  }
  0x2b   : > { %2542 = sst [smem:[#allocation30_spill]] %s2066_s26  ;;  %p2073_p12 = por %p113_p9, %p62_p2 }
  0x2c   : > { %2543 = sst [smem:[#allocation31_spill]] %s2069_s20  ;;  %p2079_p13 = por %p119_p11, %p68_p6 }
  0x2d   : > { %p325_p0 = scmp.eq.s32.totalorder %s2021_s24, 3  ;;  %p331_p5 = scmp.eq.s32.totalorder %s1390_s25, 3 }
  0x2e   : > { %s2545_s8 = scalar_select %p2079_p13, 1, 0 }
  0x2f   : > { %p1465_p4 = scmp.lt.s32.totalorder %s1900_s23, 4  ;;  %p2088_p8 = por %p325_p0, %p61_p1 }
  0x30   : > { %2546 = sst [smem:[#allocation32_spill]] %s2545_s8  ;;  %p2549_p2 = scmp.ne.s32.totalorder %s1876_s17, %s1872_s16 }
  0x31   : > { %s2547_s10 = scalar_select %p2088_p8, 1, 0 }
  0x32   : > { %p2095_p9 = por %p331_p5, %p2549_p2  ;;  %s2100_s28 = sand.u32 1, %s1880_s18  }
  0x33   : > { %2548 = sst [smem:[#allocation33_spill]] %s2547_s10  ;;  %p2104_p6 = pnand %p1465_p4, %p2038_p3 }
  0x34   : > { %s2550_s13 = scalar_select %p2095_p9, 1, 0 }
  0x35   : > { %s370_s30 = sand.u32 1, %s1900_s23   ;;  %s2553_s1 = sld [smem:[#allocation36_spill]] }
  0x36   : > { %2551 = sst [smem:[#allocation34_spill]] %s2550_s13  ;;  %s373_s26 = scalar_lea.vmem [#allocation6], %s2100_s28 }
  0x37   : > { %s380_s16 = sshll.u32 %s373_s26, 4  ;;  %p2116_p1 = pnand %p1465_p4, %p2073_p12  ;;  %s381_s16 = int_to_ptr.vmem [resolvable:$true] %s380_s16 }
  0x38   : > { %s2120_s29 = scalar_lea.sflag [#allocation7], %s370_s30  ;;  %p1405_p3 = scmp.ge.s32.totalorder %s1900_s23, 1 }
  0x39   : > { %p497_p10 = scmp.lt.s32.totalorder %s1900_s23, 5  ;;  %s2128_s27 = sand.u32 1, %s1868_s15  }
  0x3a   : > { %s1396_s26 = sshll.u32 %s2128_s27, 7  ;;  %s2556_s3 = sld [smem:[#allocation38_spill]] }
  0x3b   : > { %s376_s20 = scalar_lea.hbm %s2553_s1, %s1896_s22  ;;  %p2131_p11 = pnand %p1405_p3, %p497_p10 }
  0x3c   : > { %s378_s10 = sshll.u32 %s376_s20, 4  ;;  %s1422_s20 = sshll.u32 %s1892_s21, 7  ;;  %s379_s10 = int_to_ptr.hbm [resolvable:$true] %s378_s10 }
  0x3d   : > { %1448 = dma.hbm_to_vmem [thread:$0]  (!%p2104_p6), %s379_s10, 16, %s381_s16, %s2120_s29  }
  0x3e   : > { %s413_s16 = scalar_lea.vmem [#allocation9], %s1396_s26  ;;  %s2139_s15 = scalar_lea.sflag [#allocation10], %s370_s30 }
  0x3f   : > { %s421_s10 = sshll.u32 %s413_s16, 4  ;;  %s2518_s23 = smov 128   ;;  %s422_s10 = int_to_ptr.vmem [resolvable:$true] %s421_s10 }
  0x40   : > { %s418_s13 = scalar_lea.hbm %s2556_s3, %s1422_s20  ;;  %s2519_s4 = smov 8  }
  0x41   : > { %s419_s5 = sshll.u32 %s418_s13, 4  ;;  %s1393_s1 = sshll.u32 %s2100_s28, 3  ;;  %s420_s5 = int_to_ptr.hbm [resolvable:$true] %s419_s5 }
  0x42   : > { %1454 = dma.hbm_to_vmem [thread:$0]  (!%p2116_p1), %s420_s5, 2048, %s422_s10, %s2139_s15, %s2518_s23, %s2518_s23, %s2519_s4  }
  0x43   : > { %s1394_s13 = sshll.u32 %s1896_s22, 3  ;;  %s2557_s0 = sld [smem:[#allocation35_spill]] }
  0x44   : > { %s355_s16 = scalar_lea.vmem [#allocation3], %s1393_s1  ;;  %s1425_s30 = smul.u32 384, %s2128_s27 }
  0x45   : > { %s363_s3 = sshll.u32 %s355_s16, 4  ;;  %s352_s8 = scalar_lea.sflag [#allocation4], %s2100_s28  ;;  %s364_s3 = int_to_ptr.vmem [resolvable:$true] %s363_s3 }
  0x46   : > { %s1426_s5 = smul.u32 384, %s1892_s21  ;;  %s391_s10 = scalar_lea.vmem [#allocation8], %s1425_s30 }
  0x47   : > { %s399_s23 = sshll.u32 %s391_s10, 4  ;;  %s2558_s2 = sld [smem:[#allocation37_spill]]  ;;  %s400_s23 = int_to_ptr.vmem [resolvable:$true] %s399_s23 }
  0x48   : > { %s1399_s20 = sshll.u32 %s2128_s27, 8  ;;  %s1904_s26 = smov 384  }
  0x49   : > { %s359_s11 = scalar_lea.hbm %s2557_s0, %s1394_s13  ;;  %s1423_s28 = sshll.u32 %s1892_s21, 8 }
  0x4a   : > { %s361_s19 = sshll.u32 %s359_s11, 4  ;;  %s1905_s11 = smov 24   ;;  %s362_s19 = int_to_ptr.hbm [resolvable:$true] %s361_s19 }
  0x4b   : > { %1445 = dma.hbm_to_vmem [thread:$0]  (!%p2104_p6), %s362_s19, 128, %s364_s3, %s352_s8  }
  0x4c   : > { %s452_s8 = scalar_lea.hbm %s2498_s6, %s1423_s28  ;;  %s447_s19 = scalar_lea.vmem [#allocation11], %s1399_s20 }
  0x4d   : > { %s396_s13 = scalar_lea.hbm %s2558_s2, %s1426_s5  ;;  %s455_s4 = sshll.u32 %s447_s19, 4  ;;  %s456_s4 = int_to_ptr.vmem [resolvable:$true] %s455_s4 }
  0x4e   : > { %s397_s1 = sshll.u32 %s396_s13, 4  ;;  %s453_s22 = sshll.u32 %s452_s8, 4  ;;  %s398_s1 = int_to_ptr.hbm [resolvable:$true] %s397_s1  ;;  %s454_s22 = int_to_ptr.hbm [resolvable:$true] %s453_s22 }
  0x4f   : > { %1451 = dma.hbm_to_vmem [thread:$0]  (!%p2116_p1), %s398_s1, 6144, %s400_s23, %s2120_s29, %s1904_s26, %s1904_s26, %s1905_s11  }
  0x50   : > { %s1906_s16 = smov 256   ;;  %s1907_s30 = smov 16  }
  0x51   : > { %1457 = dma.hbm_to_vmem [thread:$0]  (!%p2116_p1), %s454_s22, 4096, %s456_s4, %s2139_s15, %s1906_s16, %s1906_s16, %s1907_s30  }
  0x52   : > { %s474_s23 = scalar_lea.hbm %s2499_s7, %s1423_s28  ;;  %s469_s13 = scalar_lea.vmem [#allocation12], %s1399_s20 }
  0x53   : > { %s475_s29 = sshll.u32 %s474_s23, 4  ;;  %s477_s1 = sshll.u32 %s469_s13, 4  ;;  %s476_s29 = int_to_ptr.hbm [resolvable:$true] %s475_s29  ;;  %s478_s1 = int_to_ptr.vmem [resolvable:$true] %s477_s1 }
  0x54   : > { %s466_s26 = scalar_lea.sflag [#allocation13], %s2128_s27  ;;  %s2559_s11 = smov 8  }
  0x55   : > { %s2560_s25 = smov 128   ;;  %501 = sbr.rel (%p2131_p11) target bundleno = 1742 (0x6ce), region = 60 }
  0x56   : > { %1460 = dma.hbm_to_vmem [thread:$0]  (!%p2116_p1), %s476_s29, 4096, %s478_s1, %s466_s26, %s2560_s25, %s2560_s25, %s2559_s11  }
  0x57   : > { %s2183_s15 = sand.u32 (!%p2131_p11), 1, %s1876_s17  }
  0x58   : > { %s2521_s20 = sshll.u32 (!%p2131_p11), %s2183_s15, 3  ;;  %s504_s28 = scalar_lea.sflag (!%p2131_p11), [#allocation4], %s2183_s15 }
  0x59   : > { %s2189_s3 = scalar_lea.vmem (!%p2131_p11), [#allocation3], %s2521_s20 }
  0x5a   : > { %1835 = dma.done.wait (%p2055_p7), %s504_s28, 128  }
  0x5b   : > { %1837 = vsyncadd (%p2055_p7), %s504_s28, 4294967168  ;;  %s513_s18 = sand.u32 1, %s2021_s24  }
  0x5c   : > { %s514_s27 = scalar_lea.sflag [#allocation7], %s513_s18 }
  0x5d   : > { %1839 = dma.done.wait (%p2055_p7), %s514_s27, 16  }
  0x5e   : > { %1841 = vsyncadd (%p2055_p7), %s514_s27, 4294967280  ;;  %s524_s19 = sand.u32 1, %s1864_s14  }
  0x5f   : > { %s1427_s4 = smul.u32 384, %s524_s19 }
  0x61   : > { %s2202_s22 = scalar_lea.vmem [#allocation8], %s1427_s4 }
  0x62   : > { %1843 = dma.done.wait (%p2079_p13), %s514_s27, 6144  }
  0x63   : > { %1845 = vsyncadd (%p2079_p13), %s514_s27, 4294961152  ;;  %s1407_s24 = sshll.u32 %s524_s19, 7  ;;  %s533_s16 = scalar_lea.sflag [#allocation10], %s513_s18 }
  0x64   : > { %s2208_s30 = scalar_lea.vmem [#allocation9], %s1407_s24 }
  0x65   : > { %1847 = dma.done.wait (%p2079_p13), %s533_s16, 6144  }
  0x66   : > { %1849 = vsyncadd (%p2079_p13), %s533_s16, 4294961152  ;;  %s1408_s12 = sshll.u32 %s524_s19, 8  ;;  %s553_s10 = scalar_lea.sflag [#allocation13], %s524_s19 }
  0x67   : > { %s2214_s5 = scalar_lea.vmem [#allocation11], %s1408_s12  ;;  %s2216_s23 = scalar_lea.vmem [#allocation12], %s1408_s12 }
  0x68   : > { %1851 = dma.done.wait (%p2079_p13), %s553_s10, 4096  }
  0x69   : > { %1853 = vsyncadd (%p2079_p13), %s553_s10, 4294963200  ;;  %s2562_s29 = sld [smem:[#allocation24_spill]]  ;;  %s2567_s0 = sshll.u32 %s2183_s15, 3 }
  0x6a   : > { %s2563_s11 = sld [smem:[#allocation39_spill]]  ;;  %s2244_s2 = scalar_lea.vmem [#allocation14], %s2567_s0 }
  0x6b   : > { %s2564_s27 = sld [smem:[#allocation40_spill]] }
  0x6c   : > { %s2565_s24 = sld [smem:[#allocation41_spill]] }
  0x6d   : > { %s2566_s9 = sld [smem:[#allocation42_spill]] }
  0x6f   : > { %p630_p4 = scmp.lt.s32.totalorder %s2562_s29, 1  ;;  %p1411_p7 = scmp.ne.s32.totalorder %s2562_s29, 0 }
  0x71   : > { %s2224_s13 = scalar_select %p630_p4, %s2562_s29, 1 }
  0x72   : > { %645 = sbr.rel (%p1411_p7) target bundleno = 121 (0x79), region = 88 }
  0x73   : > { %s632_s25 = scalar_lea.vmem %s2563_s11, %s2224_s13  ;;  %s635_s19 = scalar_lea.vmem %s2564_s27, %s2224_s13 }
  0x74   : > { %s638_s16 = scalar_lea.vmem %s2565_s24, %s2224_s13  ;;  %s641_s20 = scalar_lea.vmem %s2566_s9, %s2224_s13 }
  0x77   : > { %v646_v0 = vld [vmem:[%s2189_s3] sm:$0xff] }
  0x78   : > { %647 = vst [vmem:[%s2244_s2] sm:$0xff] %v646_v0 }
  0x79 PF: > { %v696_v1 = vld [vmem:[%s2202_s22 + $0x170] sm:$0xff]  ;;  %v693_v2 = vld [vmem:[%s2202_s22 + $0x158] sm:$0xff]  ;;  %v695_v3 = vld [vmem:[%s2202_s22 + $0x168] sm:$0xff]  ;;  %vm761_vm0 = vcmask 523264   ;;  %s1908_s0 = smov 64   ;;  %s2568_s3 = scalar_lea.vmem [#allocation6], %s2183_s15 }
  0x7a   : > { %718 = vmatpush.msra.mxu1 %v696_v1  ;;  %v690_v4 = vld [vmem:[%s2202_s22 + $0x140] sm:$0xff]  ;;  %698 = vmatpush.msra.mxu0 %v695_v3  ;;  %v692_v5 = vld [vmem:[%s2202_s22 + $0x150] sm:$0xff]  ;;  %v689_v6 = vld [vmem:[%s2202_s22 + $0x138] sm:$0xff]  ;;  %vm788_vm1 = vcmask 64512   ;;  %vm894_vm2 = vcmask 1048064   ;;  %s2571_s26 = sld [smem:[#allocation25_spill]] }
  0x7b   : > { %v687_v7 = vld [vmem:[%s2202_s22 + $0x128] sm:$0xff]  ;;  %v686_v8 = vld [vmem:[%s2202_s22 + $0x120] sm:$0xff]  ;;  %v684_v9 = vld [vmem:[%s2202_s22 + $0x110] sm:$0xff] }
  0x7c   : > { %719 = vmatpush.msra.mxu1 %v693_v2  ;;  %699 = vmatpush.msra.mxu0 %v692_v5  ;;  %v683_v10 = vld [vmem:[%s2202_s22 + $0x108] sm:$0xff]  ;;  %v681_v11 = vld [vmem:[%s2202_s22 + $0xf8] sm:$0xff]  ;;  %v680_v12 = vld [vmem:[%s2202_s22 + $0xf0] sm:$0xff] }
  0x7d   : > { %v678_v13 = vld [vmem:[%s2202_s22 + $0xe0] sm:$0xff]  ;;  %v677_v14 = vld [vmem:[%s2202_s22 + $0xd8] sm:$0xff]  ;;  %v675_v15 = vld [vmem:[%s2202_s22 + $0xc8] sm:$0xff] }
  0x7e   : > { %720 = vmatpush.msra.mxu1 %v690_v4  ;;  %700 = vmatpush.msra.mxu0 %v689_v6  ;;  %v674_v16 = vld [vmem:[%s2202_s22 + $0xc0] sm:$0xff]  ;;  %v672_v17 = vld [vmem:[%s2202_s22 + $0xb0] sm:$0xff]  ;;  %v671_v18 = vld [vmem:[%s2202_s22 + $0xa8] sm:$0xff] }
  0x7f   : > { %v669_v19 = vld [vmem:[%s2202_s22 + $0x98] sm:$0xff]  ;;  %v668_v20 = vld [vmem:[%s2202_s22 + $0x90] sm:$0xff]  ;;  %v666_v21 = vld [vmem:[%s2202_s22 + $0x80] sm:$0xff] }
  0x80   : > { %721 = vmatpush.msra.mxu1 %v687_v7  ;;  %701 = vmatpush.msra.mxu0 %v686_v8  ;;  %v665_v22 = vld [vmem:[%s2202_s22 + $0x78] sm:$0xff]  ;;  %v663_v23 = vld [vmem:[%s2202_s22 + $0x68] sm:$0xff]  ;;  %v662_v24 = vld [vmem:[%s2202_s22 + $0x60] sm:$0xff] }
  0x81   : > { %v660_v25 = vld [vmem:[%s2202_s22 + $0x50] sm:$0xff]  ;;  %v659_v26 = vld [vmem:[%s2202_s22 + $0x48] sm:$0xff]  ;;  %v657_v27 = vld [vmem:[%s2202_s22 + $0x38] sm:$0xff] }
  0x82   : > { %722 = vmatpush.msra.mxu1 %v684_v9  ;;  %702 = vmatpush.msra.mxu0 %v683_v10  ;;  %v656_v28 = vld [vmem:[%s2202_s22 + $0x30] sm:$0xff]  ;;  %v654_v29 = vld [vmem:[%s2202_s22 + $0x20] sm:$0xff]  ;;  %v653_v30 = vld [vmem:[%s2202_s22 + $0x18] sm:$0xff] }
  0x83   : > { %v651_v31 = vld [vmem:[%s2202_s22 + $0x8] sm:$0xff]  ;;  %v650_v33 = vld [vmem:[%s2202_s22] sm:$0xff]  ;;  %v697_v38 = vld [vmem:[%s2202_s22 + $0x178] sm:$0xff] }
  0x84   : > { %723 = vmatpush.msra.mxu1 %v681_v11  ;;  %703 = vmatpush.msra.mxu0 %v680_v12  ;;  %v2281_v32 = vld [vmem:[%s2244_s2] sm:$0xff]  ;;  %v688_v41 = vld [vmem:[%s2202_s22 + $0x130] sm:$0xff]  ;;  %v685_v42 = vld [vmem:[%s2202_s22 + $0x118] sm:$0xff] }
  0x85   : > { %v694_v39 = vld [vmem:[%s2202_s22 + $0x160] sm:$0xff]  ;;  %738 = vmatpush.msra.mxu2 %v697_v38  ;;  %v691_v40 = vld [vmem:[%s2202_s22 + $0x148] sm:$0xff]  ;;  %v676_v45 = vld [vmem:[%s2202_s22 + $0xd0] sm:$0xff] }
  0x86   : > { %724 = vmatpush.msra.mxu1 %v678_v13  ;;  %704 = vmatpush.msra.mxu0 %v677_v14  ;;  %v682_v43 = vld [vmem:[%s2202_s22 + $0x100] sm:$0xff]  ;;  %v679_v44 = vld [vmem:[%s2202_s22 + $0xe8] sm:$0xff]  ;;  %v673_v46 = vld [vmem:[%s2202_s22 + $0xb8] sm:$0xff] }
  0x87   : > { %739 = vmatpush.msra.mxu2 %v694_v39  ;;  %v670_v47 = vld [vmem:[%s2202_s22 + $0xa0] sm:$0xff]  ;;  %v667_v48 = vld [vmem:[%s2202_s22 + $0x88] sm:$0xff]  ;;  %v664_v49 = vld [vmem:[%s2202_s22 + $0x70] sm:$0xff] }
  0x88   : > { %725 = vmatpush.msra.mxu1 %v675_v15  ;;  %705 = vmatpush.msra.mxu0 %v674_v16  ;;  %v661_v50 = vld [vmem:[%s2202_s22 + $0x58] sm:$0xff]  ;;  %v658_v51 = vld [vmem:[%s2202_s22 + $0x40] sm:$0xff]  ;;  %v655_v52 = vld [vmem:[%s2202_s22 + $0x28] sm:$0xff] }
  0x89   : > { %740 = vmatpush.msra.mxu2 %v691_v40  ;;  %v652_v53 = vld [vmem:[%s2202_s22 + $0x10] sm:$0xff]  ;;  %v1563_v54 = vld [vmem:[%s2568_s3] ss:$0 sm:$0xff]  ;;  %v912_v15 = vld [vmem:[%s2208_s30 + $0x78] sm:$0xff]  ;;  %s1164_s3 = sshll.u32 %s2244_s2, 4  ;;  %s1165_s3 = int_to_ptr.vmem [resolvable:$true] %s1164_s3 }
  0x8a   : > { %726 = vmatpush.msra.mxu1 %v672_v17  ;;  %706 = vmatpush.msra.mxu0 %v671_v18  ;;  %v911_v16 = vld [vmem:[%s2208_s30 + $0x70] sm:$0xff]  ;;  %v910_v17 = vld [vmem:[%s2208_s30 + $0x68] sm:$0xff]  ;;  %v909_v18 = vld [vmem:[%s2208_s30 + $0x60] sm:$0xff] }
  0x8b   : > { %741 = vmatpush.msra.mxu2 %v688_v41  ;;  %v1002_v39 = vld [vmem:[%s2214_s5 + $0xf0] sm:$0xff]  ;;  %v1003_v40 = vld [vmem:[%s2214_s5 + $0xf8] sm:$0xff]  ;;  %v1000_v41 = vld [vmem:[%s2214_s5 + $0xe0] sm:$0xff] }
  0x8c   : > { %727 = vmatpush.msra.mxu1 %v669_v19  ;;  %707 = vmatpush.msra.mxu0 %v668_v20  ;;  %v908_v19 = vld [vmem:[%s2208_s30 + $0x58] sm:$0xff]  ;;  %v907_v20 = vld [vmem:[%s2208_s30 + $0x50] sm:$0xff] }
  0x8d   : > { %742 = vmatpush.msra.mxu2 %v685_v42  ;;  %v1001_v42 = vld [vmem:[%s2214_s5 + $0xe8] sm:$0xff] }
  0x8e   : > { %728 = vmatpush.msra.mxu1 %v666_v21  ;;  %708 = vmatpush.msra.mxu0 %v665_v22  ;;  %v906_v21 = vld [vmem:[%s2208_s30 + $0x48] sm:$0xff]  ;;  %v905_v22 = vld [vmem:[%s2208_s30 + $0x40] sm:$0xff] }
  0x8f   : > { %743 = vmatpush.msra.mxu2 %v682_v43  ;;  %v998_v43 = vld [vmem:[%s2214_s5 + $0xd0] sm:$0xff] }
  0x90   : > { %729 = vmatpush.msra.mxu1 %v663_v23  ;;  %709 = vmatpush.msra.mxu0 %v662_v24  ;;  %v904_v23 = vld [vmem:[%s2208_s30 + $0x38] sm:$0xff]  ;;  %v903_v24 = vld [vmem:[%s2208_s30 + $0x30] sm:$0xff] }
  0x91   : > { %744 = vmatpush.msra.mxu2 %v679_v44  ;;  %v999_v44 = vld [vmem:[%s2214_s5 + $0xd8] sm:$0xff] }
  0x92   : > { %730 = vmatpush.msra.mxu1 %v660_v25  ;;  %710 = vmatpush.msra.mxu0 %v659_v26  ;;  %v902_v25 = vld [vmem:[%s2208_s30 + $0x28] sm:$0xff]  ;;  %v901_v26 = vld [vmem:[%s2208_s30 + $0x20] sm:$0xff] }
  0x93   : > { %745 = vmatpush.msra.mxu2 %v676_v45  ;;  %v996_v45 = vld [vmem:[%s2214_s5 + $0xc0] sm:$0xff] }
  0x94   : > { %731 = vmatpush.msra.mxu1 %v657_v27  ;;  %711 = vmatpush.msra.mxu0 %v656_v28 }
  0x95   : > { %746 = vmatpush.msra.mxu2 %v673_v46  ;;  %v997_v46 = vld [vmem:[%s2214_s5 + $0xc8] sm:$0xff] }
  0x96   : > { %732 = vmatpush.msra.mxu1 %v654_v29  ;;  %712 = vmatpush.msra.mxu0 %v653_v30  ;;  %v900_v29 = vld [vmem:[%s2208_s30 + $0x18] sm:$0xff]  ;;  %v899_v30 = vld [vmem:[%s2208_s30 + $0x10] sm:$0xff] }
  0x97   : > { %747 = vmatpush.msra.mxu2 %v670_v47  ;;  %v994_v47 = vld [vmem:[%s2214_s5 + $0xb0] sm:$0xff] }
  0x98   : > { %733 = vmatpush.msra.mxu1 %v651_v31  ;;  %713 = vmatpush.msra.mxu0 %v650_v33  ;;  %v898_v31 = vld [vmem:[%s2208_s30 + $0x8] sm:$0xff]  ;;  %v897_v33 = vld [vmem:[%s2208_s30] sm:$0xff] }
  0x99   : > { %734 = vmatmul.f32.vlgmr.msra.gmra.mxu1 %v2281_v32  ;;  %714 = vmatmul.f32.vlgmr.msra.gmra.mxu0 %v2281_v32 }
  0x9a   : > { %748 = vmatpush.msra.mxu2 %v667_v48  ;;  %v995_v48 = vld [vmem:[%s2214_s5 + $0xb8] sm:$0xff] }
  0x9c   : > { %749 = vmatpush.msra.mxu2 %v664_v49 }
  0x9e   : > { %750 = vmatpush.msra.mxu2 %v661_v50  ;;  %v992_v50 = vld [vmem:[%s2214_s5 + $0xa0] sm:$0xff] }
  0xa0   : > { %751 = vmatpush.msra.mxu2 %v658_v51  ;;  %v993_v51 = vld [vmem:[%s2214_s5 + $0xa8] sm:$0xff] }
  0xa2   : > { %752 = vmatpush.msra.mxu2 %v655_v52  ;;  %v990_v52 = vld [vmem:[%s2214_s5 + $0x90] sm:$0xff] }
  0xa4   : > { %753 = vmatpush.msra.mxu2 %v652_v53  ;;  %v991_v53 = vld [vmem:[%s2214_s5 + $0x98] sm:$0xff] }
  0xa5   : > { %754 = vmatmul.f32.vlgmr.msra.gmra.mxu2 %v2281_v32 }
 0x116   : > { %v735_v34 = vpop.f32.mrf.mxu1  ;;  %v715_v35 = vpop.f32.mrf.mxu0 }
 0x117   : > { %826 = vrot.lane.b32.xlu0 %v735_v34, %s1908_s0  ;;  %1412 = vmatpush.xpose.msk.msrb.mxu0 %vm761_vm0, %v735_v34 }
 0x11a   : > { %1413 = vmatmul.msk.f32.vlgmr.msrb.gmra.mxu0 %vm761_vm0, %v715_v35 }
 0x11b   : > { %1004 = vmatpush.msra.mxu0 %v1002_v39  ;;  %v1053_v39 = vld [vmem:[%s2216_s23 + $0x38] sm:$0xff] }
 0x11d   : > { %1005 = vmatpush.msra.mxu0 %v1000_v41 }
 0x11f   : > { %824 = vrot.lane.b32.xlu0 %v715_v35, %s1908_s0  ;;  %1006 = vmatpush.msra.mxu0 %v998_v43 }
 0x121   : > { %1007 = vmatpush.msra.mxu0 %v996_v45  ;;  %v1067_v45 = vld [vmem:[%s2216_s23 + $0xa8] sm:$0xff] }
 0x123   : > { %1008 = vmatpush.msra.mxu0 %v994_v47  ;;  %v1050_v47 = vld [vmem:[%s2216_s23 + $0x20] sm:$0xff] }
 0x125   : > { %1009 = vmatpush.msra.mxu0 %v992_v50  ;;  %v1049_v50 = vld [vmem:[%s2216_s23 + $0x18] sm:$0xff] }
 0x127   : > { %1010 = vmatpush.msra.mxu0 %v990_v52 }
 0x128   : > { %v755_v5 = vpop.f32.mrf.mxu2 }
 0x129   : > { %818 = vmatpush.msrb.mxu2 %v755_v5 }
 0x189   : > { %v827_v36 = vpop.permute.xlu0 %826 }
 0x18a   : > { %1415 = vmatpush.xpose.msk.msrb.mxu1 %vm761_vm0, %v827_v36 }
 0x18e   : > { %1024 = vmatpush.msra.mxu1 %v1003_v40  ;;  %v1069_v40 = vld [vmem:[%s2216_s23 + $0xb8] sm:$0xff] }
 0x190   : > { %1025 = vmatpush.msra.mxu1 %v1001_v42  ;;  %v1052_v42 = vld [vmem:[%s2216_s23 + $0x30] sm:$0xff] }
 0x191   : > { %v825_v37 = vpop.permute.xlu0 %824 }
 0x192   : > { %1416 = vmatmul.msk.f32.vlgmr.msrb.gmra.mxu1 %vm761_vm0, %v825_v37 }
 0x193   : > { %1026 = vmatpush.msra.mxu1 %v999_v44  ;;  %v1051_v44 = vld [vmem:[%s2216_s23 + $0x28] sm:$0xff] }
 0x195   : > { %1027 = vmatpush.msra.mxu1 %v997_v46 }
 0x197   : > { %v785_v58 = vpop.f32.mrf.mxu0  ;;  %1028 = vmatpush.msra.mxu1 %v995_v48  ;;  %v1066_v48 = vld [vmem:[%s2216_s23 + $0xa0] sm:$0xff] }
 0x198   : > { %v786_v59 = vadd.f32 %v1563_v54, %v785_v58  ;;  %v987_v58 = vld [vmem:[%s2214_s5 + $0x78] sm:$0xff] }
 0x199   : > { %1029 = vmatpush.msra.mxu1 %v993_v51  ;;  %v1065_v51 = vld [vmem:[%s2216_s23 + $0x98] sm:$0xff] }
 0x19a   : > { %v789_v60 = vsel %vm788_vm1, %v786_v59, -inf }
 0x19b   : > { %1030 = vmatpush.msra.mxu1 %v991_v53  ;;  %v1564_v53 = vld [vmem:[%s632_s25] ss:$0 sm:$0xff] }
 0x20f   : > { %v849_v55 = vpop.f32.mrf.mxu1 }
 0x210   : > { %v850_v56 = vadd.f32 %v1563_v54, %v849_v55  ;;  %v988_v55 = vld [vmem:[%s2214_s5 + $0x80] sm:$0xff] }
 0x211   : > { %1011 = vmatpush.msra.mxu0 %v988_v55  ;;  %v1048_v55 = vld [vmem:[%s2216_s23 + $0x10] sm:$0xff] }
 0x212   : > { %v852_v57 = vsel %vm788_vm1, %v850_v56, -inf }
 0x213   : > { %853 = vmax.xlane.f32.xlu1 %v852_v57  ;;  %v986_v57 = vld [vmem:[%s2214_s5 + $0x70] sm:$0xff] }
 0x214   : > { %1012 = vmatpush.msra.mxu0 %v986_v57 }
 0x21b   : > { %790 = vmax.xlane.f32.xlu1 %v789_v60  ;;  %v984_v60 = vld [vmem:[%s2214_s5 + $0x60] sm:$0xff] }
 0x21c   : > { %1013 = vmatpush.msra.mxu0 %v984_v60 }
 0x286   : > { %v854_v61 = vpop.xlane.xlu1 %853 }
 0x287   : > { %v855_v62 = vsub.f32 %v850_v56, %v854_v61  ;;  %v989_v56 = vld [vmem:[%s2214_s5 + $0x88] sm:$0xff] }
 0x288   : > { %1031 = vmatpush.msra.mxu1 %v989_v56  ;;  %v985_v61 = vld [vmem:[%s2214_s5 + $0x68] sm:$0xff]  ;;  %v1064_v56 = vld [vmem:[%s2216_s23 + $0x90] sm:$0xff] }
 0x289   : > { %v856_v63 = vmul.f32 1.442695, %v855_v62  ;;  %v982_v62 = vld [vmem:[%s2214_s5 + $0x50] sm:$0xff] }
 0x28a   : > { %1032 = vmatpush.msra.mxu1 %v987_v58  ;;  %1014 = vmatpush.msra.mxu0 %v982_v62  ;;  %v1063_v62 = vld [vmem:[%s2216_s23 + $0x88] sm:$0xff] }
 0x28b   : > { %1568 = vpow2.f32 %v856_v63  ;;  %v983_v63 = vld [vmem:[%s2214_s5 + $0x58] sm:$0xff] }
 0x28c   : > { %1033 = vmatpush.msra.mxu1 %v985_v61 }
 0x28e   : > { %v791_v0 = vpop.xlane.xlu1 %790  ;;  %1034 = vmatpush.msra.mxu1 %v983_v63  ;;  %v1046_v63 = vld [vmem:[%s2216_s23] sm:$0xff] }
 0x28f   : > { %v792_v1 = vsub.f32 %v786_v59, %v791_v0 }
 0x291   : > { %v1569_v2 = vpop.eup %1568  ;;  %v793_v3 = vmul.f32 1.442695, %v792_v1  ;;  %v980_v1 = vld [vmem:[%s2214_s5 + $0x40] sm:$0xff] }
 0x292   : > { %v858_v4 = vsel %vm788_vm1, %v1569_v2, 0.0  ;;  %1015 = vmatpush.msra.mxu0 %v980_v1 }
 0x293   : > { %1570 = vpow2.f32 %v793_v3  ;;  %859 = vadd.xlane.f32.xlu2 %v858_v4  ;;  %v978_v3 = vld [vmem:[%s2214_s5 + $0x30] sm:$0xff]  ;;  %v979_v4 = vld [vmem:[%s2214_s5 + $0x38] sm:$0xff] }
 0x294   : > { %1016 = vmatpush.msra.mxu0 %v978_v3 }
 0x299   : > { %v1571_v6 = vpop.eup %1570 }
 0x29a   : > { %v795_v7 = vsel %vm788_vm1, %v1571_v6, 0.0 }
 0x29b   : > { %796 = vadd.xlane.f32.xlu0 %v795_v7  ;;  %v977_v7 = vld [vmem:[%s2214_s5 + $0x28] sm:$0xff] }
 0x2ab   : > { %864 = vrot.lane.b32.xlu2 %v755_v5, %s1908_s0 }
 0x306   : > { %v860_v8 = vpop.xlane.xlu2 %859 }
 0x307   : > { %1572 = vrcp.f32 %v860_v8  ;;  %v974_v8 = vld [vmem:[%s2214_s5 + $0x10] sm:$0xff] }
 0x30d   : > { %v1573_v9 = vpop.eup %1572 }
 0x30e   : > { %v865_v10 = vpop.permute.xlu2 %864  ;;  %v797_v11 = vpop.xlane.xlu0 %796  ;;  %v862_v12 = vmul.f32 %v1573_v9, %v1569_v2  ;;  %v981_v2 = vld [vmem:[%s2214_s5 + $0x48] sm:$0xff]  ;;  %v975_v9 = vld [vmem:[%s2214_s5 + $0x18] sm:$0xff] }
 0x30f   : > { %1574 = vrcp.f32 %v797_v11  ;;  %885 = vmatpush.msra.mxu3 %v865_v10  ;;  %1035 = vmatpush.msra.mxu1 %v981_v2  ;;  %v972_v10 = vld [vmem:[%s2214_s5] sm:$0xff]  ;;  %v973_v11 = vld [vmem:[%s2214_s5 + $0x8] sm:$0xff] }
 0x310   : > { %1417 = vmatmul.msk.f32.vlgmr.msra.gmra.mxu3 %vm788_vm1, %v862_v12 }
 0x311   : > { %913 = vmatpush.msrb.mxu3 %v912_v15  ;;  %1036 = vmatpush.msra.mxu1 %v979_v4  ;;  %v1061_v15 = vld [vmem:[%s2216_s23 + $0x78] sm:$0xff] }
 0x312   : > { %1078 = vmatpush.msra.mxu2 %v1061_v15 }
 0x313   : > { %914 = vmatpush.msrb.mxu3 %v911_v16  ;;  %1037 = vmatpush.msra.mxu1 %v977_v7  ;;  %v1077_v16 = vld [vmem:[%s2216_s23 + $0xf8] sm:$0xff] }
 0x315   : > { %v1575_v13 = vpop.eup %1574  ;;  %915 = vmatpush.msrb.mxu3 %v910_v17  ;;  %1038 = vmatpush.msra.mxu1 %v975_v9  ;;  %v1060_v17 = vld [vmem:[%s2216_s23 + $0x70] sm:$0xff] }
 0x316   : > { %v799_v14 = vmul.f32 %v1575_v13, %v1571_v6  ;;  %v976_v6 = vld [vmem:[%s2214_s5 + $0x20] sm:$0xff]  ;;  %1079 = vmatpush.msra.mxu2 %v1060_v17 }
 0x317   : > { %916 = vmatpush.msrb.mxu3 %v909_v18  ;;  %1017 = vmatpush.msra.mxu0 %v976_v6 }
 0x318   : > { %1414 = vmatmul.msk.f32.vlgmr.msrb.gmra.mxu2 %vm788_vm1, %v799_v14  ;;  %1039 = vmatpush.msra.mxu1 %v973_v11 }
 0x319   : > { %917 = vmatpush.msrb.mxu3 %v908_v19  ;;  %1018 = vmatpush.msra.mxu0 %v974_v8  ;;  %v1076_v19 = vld [vmem:[%s2216_s23 + $0xf0] sm:$0xff] }
 0x31b   : > { %918 = vmatpush.msrb.mxu3 %v907_v20  ;;  %1019 = vmatpush.msra.mxu0 %v972_v10 }
 0x31d   : > { %919 = vmatpush.msrb.mxu3 %v906_v21 }
 0x31f   : > { %920 = vmatpush.msrb.mxu3 %v905_v22  ;;  %v1059_v22 = vld [vmem:[%s2216_s23 + $0x68] sm:$0xff] }
 0x320   : > { %1080 = vmatpush.msra.mxu2 %v1059_v22 }
 0x321   : > { %921 = vmatpush.msrb.mxu3 %v904_v23  ;;  %v1075_v23 = vld [vmem:[%s2216_s23 + $0xe8] sm:$0xff] }
 0x323   : > { %922 = vmatpush.msrb.mxu3 %v903_v24 }
 0x325   : > { %923 = vmatpush.msrb.mxu3 %v902_v25  ;;  %v1058_v25 = vld [vmem:[%s2216_s23 + $0x60] sm:$0xff] }
 0x326   : > { %1081 = vmatpush.msra.mxu2 %v1058_v25 }
 0x327   : > { %924 = vmatpush.msrb.mxu3 %v901_v26  ;;  %v1074_v26 = vld [vmem:[%s2216_s23 + $0xe0] sm:$0xff] }
 0x329   : > { %925 = vmatpush.msrb.mxu3 %v900_v29  ;;  %v1073_v29 = vld [vmem:[%s2216_s23 + $0xd8] sm:$0xff] }
 0x32b   : > { %926 = vmatpush.msrb.mxu3 %v899_v30  ;;  %v1056_v30 = vld [vmem:[%s2216_s23 + $0x50] sm:$0xff] }
 0x32d   : > { %927 = vmatpush.msrb.mxu3 %v898_v31  ;;  %v1072_v31 = vld [vmem:[%s2216_s23 + $0xd0] sm:$0xff] }
 0x32f   : > { %928 = vmatpush.msrb.mxu3 %v897_v33  ;;  %v1055_v33 = vld [vmem:[%s2216_s23 + $0x48] sm:$0xff] }
 0x331   : > { %1098 = vmatpush.msra.mxu3 %v1077_v16 }
 0x333   : > { %1099 = vmatpush.msra.mxu3 %v1076_v19 }
 0x335   : > { %1100 = vmatpush.msra.mxu3 %v1075_v23 }
 0x337   : > { %1101 = vmatpush.msra.mxu3 %v1074_v26 }
 0x339   : > { %1102 = vmatpush.msra.mxu3 %v1073_v29 }
 0x33b   : > { %1103 = vmatpush.msra.mxu3 %v1072_v31 }
 0x393   : > { %v887_v27 = vpop.f32.mrf.mxu3 }
 0x394   : > { %891 = vrot.lane.b32.xlu1 %v887_v27, %s1908_s0 }
 0x39b   : > { %v820_v28 = vpop.f32.mrf.mxu2 }
 0x39c   : > { %823 = vst.msk [vmem:[#allocation2] sm:$0xff] %vm761_vm0, %v820_v28  ;;  %v1057_v28 = vld [vmem:[%s2216_s23 + $0x58] sm:$0xff] }
 0x39d   : > { %1082 = vmatpush.msra.mxu2 %v1057_v28 }
 0x39f   : > { %1083 = vmatpush.msra.mxu2 %v1056_v30 }
 0x3a1   : > { %1084 = vmatpush.msra.mxu2 %v1055_v33 }
 0x406   : > { %v892_v34 = vpop.permute.xlu1 %891 }
 0x407   : > { %895 = vst.msk [vmem:[#allocation2] sm:$0xff] %vm894_vm2, %v892_v34  ;;  %v1071_v34 = vld [vmem:[%s2216_s23 + $0xc8] sm:$0xff] }
 0x408   : > { %1104 = vmatpush.msra.mxu3 %v1071_v34 }
 0x40e   : > { %v896_v35 = vld [vmem:[#allocation2] sm:$0xff] }
 0x40f   : > { %929 = vmatmul.f32.vlgmr.msrb.gmra.mxu3 %v896_v35  ;;  %v1054_v35 = vld [vmem:[%s2216_s23 + $0x40] sm:$0xff] }
 0x410   : > { %1085 = vmatpush.msra.mxu2 %v1054_v35 }
 0x412   : > { %1086 = vmatpush.msra.mxu2 %v1053_v39 }
 0x414   : > { %1087 = vmatpush.msra.mxu2 %v1052_v42 }
 0x416   : > { %1088 = vmatpush.msra.mxu2 %v1051_v44 }
 0x418   : > { %1089 = vmatpush.msra.mxu2 %v1050_v47 }
 0x41a   : > { %1090 = vmatpush.msra.mxu2 %v1049_v50 }
 0x41c   : > { %1091 = vmatpush.msra.mxu2 %v1048_v55 }
 0x492   : > { %v930_v36 = vpop.f32.mrf.mxu3 }
 0x493   : > { %v2337_v37 = vadd.f32 %v930_v36, %v2281_v32  ;;  %v1909_v32 = vmov 128.0   ;;  %v1070_v36 = vld [vmem:[%s2216_s23 + $0xc0] sm:$0xff] }
 0x494   : > { %1576 = vrcp.f32 %v1909_v32  ;;  %1105 = vmatpush.msra.mxu3 %v1070_v36  ;;  %v1068_v32 = vld [vmem:[%s2216_s23 + $0xb0] sm:$0xff] }
 0x495   : > { %935 = vadd.xlane.f32.xlu2 %v2337_v37  ;;  %v945_v38 = vmul.f32 %v2337_v37, %v2337_v37 }
 0x496   : > { %1106 = vmatpush.msra.mxu3 %v1069_v40 }
 0x497   : > { %946 = vadd.xlane.f32.xlu1 %v945_v38 }
 0x498   : > { %1107 = vmatpush.msra.mxu3 %v1068_v32 }
 0x49a   : > { %v1577_v49 = vpop.eup %1576  ;;  %1108 = vmatpush.msra.mxu3 %v1067_v45 }
 0x49b   : > { %v938_v54 = vmul.f32 128.0, %v1577_v49  ;;  %vm942_vm3 = vweird.f32 %v1577_v49 }
 0x49c   : > { %1109 = vmatpush.msra.mxu3 %v1066_v48 }
 0x49d   : > { %v939_v59 = vsub.f32 1.0, %v938_v54 }
 0x49e   : > { %1110 = vmatpush.msra.mxu3 %v1065_v51 }
 0x49f   : > { %v940_v0 = vmul.f32 %v1577_v49, %v939_v59  ;;  %v1565_v59 = vld [vmem:[%s635_s19] ss:$0 sm:$0xff]  ;;  %s2573_s19 = sld [smem:[#allocation43_spill]] }
 0x4a0   : > { %1111 = vmatpush.msra.mxu3 %v1064_v56 }
 0x4a1   : > { %v941_v5 = vadd.f32 %v1577_v49, %v940_v0  ;;  %v1062_v0 = vld [vmem:[%s2216_s23 + $0x80] sm:$0xff] }
 0x4a2   : > { %1112 = vmatpush.msra.mxu3 %v1063_v62 }
 0x4a3   : > { %v2374_v12 = vsel %vm942_vm3, %v1577_v49, %v941_v5 }
 0x4a4   : > { %1113 = vmatpush.msra.mxu3 %v1062_v0 }
 0x4a5   : > { %s2574_s8 = smov %s2573_s19 }
 0x4a6   : > { %s1782_s13 = scalar_lea.hbm %s2574_s8, 16 }
 0x508   : > { %v936_v13 = vpop.xlane.xlu2 %935 }
 0x509   : > { %v2377_v14 = vmul.f32 %v2374_v12, %v936_v13 }
 0x50a   : > { %v947_v18 = vpop.xlane.xlu1 %946 }
 0x50b   : > { %v949_v20 = vmul.f32 %v2377_v14, %v2377_v14  ;;  %v948_v21 = vmul.f32 %v947_v18, %v2374_v12  ;;  %v951_v54 = vsub.f32 %v2337_v37, %v2377_v14  ;;  %v1047_v37 = vld [vmem:[%s2216_s23 + $0x8] sm:$0xff]  ;;  %s1419_s23 = sshll.u32 %s2571_s26, 3 }
 0x50c   : > { %1092 = vmatpush.msra.mxu2 %v1047_v37  ;;  %s1162_s4 = scalar_lea.hbm %s2573_s19, %s1419_s23 }
 0x50d   : > { %v950_v24 = vsub.f32 %v948_v21, %v949_v20  ;;  %s1166_s9 = sshll.u32 %s1162_s4, 4  ;;  %s1167_s9 = int_to_ptr.hbm [resolvable:$true] %s1166_s9 }
 0x50e   : > { %1093 = vmatpush.msra.mxu2 %v1046_v63  ;;  %s1776_s22 = sshra.s32 %s1167_s9, 4  ;;  %s1777_s22 = int_to_ptr.hbm [resolvable:$true] %s1776_s22 }
 0x50f   : > { %v952_v27 = vadd.f32 1e-05, %v950_v24  ;;  %s1778_s30 = scalar_lea.hbm %s1777_s22, 8  ;;  %p1783_p5 = scmp.lt.s32.totalorder %s1777_s22, %s2574_s8 }
 0x510   : > { %p1779_p12 = scmp.ne.s32.totalorder %s1777_s22, %s1778_s30  ;;  %p1784_p2 = scmp.lt.s32.totalorder %s1782_s13, %s1778_s30 }
 0x511   : > { %1578 = vrsqrt.f32 %v952_v27  ;;  %vm959_vm5 = vweird.f32 %v952_v27 }
 0x512   : > { %p1780_p13 = pnand %p1779_p12, %p2088_p8  ;;  %p1785_p6 = por %p1784_p2, %p1783_p5 }
 0x514   : > { %p1781_p0 = pneg %p1780_p13 }
 0x516   : > { %p1786_p1 = pnand %p1785_p6, %p1781_p0 }
 0x517   : > { %v1579_v38 = vpop.eup %1578 }
 0x518   : > { %v954_v41 = vmul.f32 %v1579_v38, %v952_v27  ;;  %vm960_vm4 = vweird.f32 %v1579_v38  ;;  %v1567_v27 = vld [vmem:[%s641_s20] ss:$0 sm:$0xff] }
 0x519   : > { %vm961_vm6 = vmor %vm959_vm5, %vm960_vm4 }
 0x51a   : > { %v955_v43 = vmul.f32 %v1579_v38, %v954_v41 }
 0x51c   : > { %v956_v46 = vmul.f32 0.5, %v955_v43 }
 0x51e   : > { %v957_v49 = vsub.f32 1.5, %v956_v46 }
 0x520   : > { %v958_v52 = vmul.f32 %v1579_v38, %v957_v49 }
 0x522   : > { %v962_v57 = vsel %vm961_vm6, %v1579_v38, %v958_v52 }
 0x523   : > { %v963_v58 = vmul.f32 %v962_v57, %v951_v54 }
 0x525   : > { %v967_v60 = vmul.f32 %v1564_v53, %v963_v58 }
 0x527   : > { %v971_v61 = vadd.f32 %v1565_v59, %v967_v60 }
 0x529   : > { %1020 = vmatmul.f32.vlgmr.msra.gmra.mxu0 %v971_v61  ;;  %1040 = vmatmul.f32.vlgmr.msra.gmra.mxu1 %v971_v61 }
 0x5a6   : > { %v1021_v1 = vpop.f32.mrf.mxu0  ;;  %v1041_v2 = vpop.f32.mrf.mxu1 }
 0x5a7   : > { %v1044_v3 = vmax.f32 %v1021_v1, 0.0  ;;  %v1045_v4 = vmax.f32 %v1041_v2, 0.0 }
 0x5a9   : > { %1094 = vmatmul.f32.vlgmr.msra.gmra.mxu2 %v1044_v3  ;;  %1114 = vmatmul.f32.vlgmr.msra.gmra.mxu3 %v1045_v4 }
 0x62c   : > { %v1095_v5 = vpop.f32.mrf.mxu2  ;;  %v1115_v7 = vpop.f32.mrf.mxu3 }
 0x62d   : > { %v1096_v6 = vadd.f32 %v1095_v5, %v971_v61 }
 0x62f   : > { %v1116_v8 = vadd.f32 %v1115_v7, %v1096_v6 }
 0x631   : > { %1120 = vadd.xlane.f32.xlu0 %v1116_v8  ;;  %v1123_v9 = vmul.f32 %v1116_v8, %v1116_v8 }
 0x639   : > { %1124 = vadd.xlane.f32.xlu0 %v1123_v9 }
 0x6a4   : > { %v1121_v10 = vpop.xlane.xlu0 %1120 }
 0x6a5   : > { %v1122_v11 = vmul.f32 %v1121_v10, %v2374_v12 }
 0x6a7   : > { %v1127_v14 = vmul.f32 %v1122_v11, %v1122_v11  ;;  %v1129_v24 = vsub.f32 %v1116_v8, %v1122_v11 }
 0x6ac   : > { %v1125_v13 = vpop.xlane.xlu0 %1124 }
 0x6ad   : > { %v1126_v15 = vmul.f32 %v1125_v13, %v2374_v12  ;;  %v1566_v12 = vld [vmem:[%s638_s16] ss:$0 sm:$0xff]  ;;  %s1152_s16 = scalar_lea.sflag [#allocation5], %s2183_s15 }
 0x6af   : > { %v1128_v16 = vsub.f32 %v1126_v15, %v1127_v14 }
 0x6b1   : > { %v1130_v17 = vadd.f32 1e-05, %v1128_v16 }
 0x6b3   : > { %1580 = vrsqrt.f32 %v1130_v17  ;;  %vm1137_vm8 = vweird.f32 %v1130_v17 }
 0x6b9   : > { %v1581_v18 = vpop.eup %1580 }
 0x6ba   : > { %v1132_v19 = vmul.f32 %v1581_v18, %v1130_v17  ;;  %vm1138_vm7 = vweird.f32 %v1581_v18 }
 0x6bb   : > { %vm1139_vm9 = vmor %vm1137_vm8, %vm1138_vm7 }
 0x6bc   : > { %v1133_v20 = vmul.f32 %v1581_v18, %v1132_v19 }
 0x6be   : > { %v1134_v21 = vmul.f32 0.5, %v1133_v20 }
 0x6c0   : > { %v1135_v22 = vsub.f32 1.5, %v1134_v21 }
 0x6c2   : > { %v1136_v23 = vmul.f32 %v1581_v18, %v1135_v22 }
 0x6c4   : > { %v1140_v25 = vsel %vm1139_vm9, %v1581_v18, %v1136_v23 }
 0x6c5   : > { %v1141_v26 = vmul.f32 %v1140_v25, %v1129_v24 }
 0x6c7   : > { %v1145_v28 = vmul.f32 %v1566_v12, %v1141_v26 }
 0x6c9   : > { %v1149_v29 = vadd.f32 %v1567_v27, %v1145_v28 }
 0x6cb   : > { %1150 = vst [vmem:[%s2244_s2] sm:$0xff] %v1149_v29 }
 0x6cc   : > { %1789 = shalt.err (!%p1786_p1)
}
 0x6cd   : > { %1440 = dma.vmem_to_hbm [thread:$0]  (%p2088_p8), %s1165_s3, 128, %s1167_s9, %s1152_s16  }
 0x6ce PF: > { %s2577_s2 = sld [smem:[#allocation27_spill]] }
 0x6cf   : > { %s2578_s15 = sld [smem:[#allocation22_spill]] }
 0x6d4   : > { %p1466_p3 = scmp.ge.s32.totalorder %s2577_s2, 2 }
 0x6d5   : > { %s1178_s23 = sand.u32 1, %s2578_s15  }
 0x6d6   : > { %p1462_p10 = pnand %p1466_p3, %p2095_p9  ;;  %s1179_s11 = scalar_lea.sflag [#allocation5], %s1178_s23 }
 0x6d8   : > { %p1463_p11 = pneg %p1462_p10 }
 0x6da   : > { %1855 = dma.done.wait (%p1463_p11), %s1179_s11, 128  }
 0x6db   : > { %1857 = vsyncadd (%p1463_p11), %s1179_s11, 4294967168  ;;  %s35_s23 = sadd.s32 1, %s2577_s2   ;;  %s2580_s25 = sld [smem:[#allocation21_spill]] }
 0x6dc   : > { %p32_p4 = scmp.ge.s32.totalorder %s35_s23, 6   ;;  %s2581_s15 = sld [smem:[#allocation30_spill]] }
 0x6dd   : > { %s2582_s28 = sld [smem:[#allocation23_spill]]  ;;  %s2587_s13 = smov %s1864_s14 }
 0x6de   : > { %s2583_s18 = sld [smem:[#allocation31_spill]]  ;;  %s2589_s16 = smov %s1876_s17 }
 0x6df   : > { %s2584_s20 = sld [smem:[#allocation26_spill]]  ;;  %s2591_s19 = smov %s1892_s21 }
 0x6e0   : > { %s2585_s27 = sld [smem:[#allocation28_spill]] }
 0x6e1   : > { %s2586_s22 = sld [smem:[#allocation29_spill]]  ;;  %s2588_s14 = smov %s2580_s25 }
 0x6e2   :  { %34 = sbr.rel (!%p32_p4) target bundleno = 25 (0x19), region = 182 }
 0x6e3   : > { %s2590_s17 = smov %s2582_s28 }
 0x6e6   : > { %s2592_s21 = smov %s2585_s27 }
 0x6e7   :  { %1185 = vsyncpa [#allocation4], 1 }
 0x6e8   :  { %1187 = vsyncpa [#allocation4 + $0x1], 1 }
 0x6e9   :  { %1188 = vsyncpa [#allocation7], 1 }
 0x6ea   :  { %1190 = vsyncpa [#allocation7 + $0x1], 1 }
 0x6eb   :  { %1191 = vsyncpa [#allocation10], 1 }
 0x6ec   :  { %1193 = vsyncpa [#allocation10 + $0x1], 1 }
 0x6ed   :  { %1194 = vsyncpa [#allocation13], 1 }
 0x6ee   :  { %1196 = vsyncpa [#allocation13 + $0x1], 1 }
 0x6ef   :  { %1197 = vsyncpa [#allocation5], 1 }
 0x6f0   :  { %1199 = vsyncpa [#allocation5 + $0x1], 1 }

</bundles_post_ra>
